<compile_context>
chip_gen: v7x
topology: tpu7x:2x2x1
jax: 0.10.0
libtpu: 0.0.40
codegen_flags: <defaults>
</compile_context>

<pallas_src>
import functools

import numpy as np
import jax
import jax.numpy as jnp
from jax import lax
from jax.experimental import pallas as pl
from jax.experimental.pallas import tpu as pltpu

EPSILON = float(np.finfo(np.float32).eps)   # torch.clamp(min=...) in rec_euclidean
COSINE_EPS = 1e-8                           # torch F.cosine_similarity default eps


def _round_up(n, m):
    return ((n + m - 1) // m) * m


def _layer_structure(dimensions, latent_dim, estimation_hidden_size, n_gmm):
    """All linear layers in execution order as ((fan_in, fan_out), apply_tanh)."""
    layer_dims, tanh_flags = [], []
    # encoder: Linear+Tanh per consecutive pair, then Linear(dims[-1], latent)
    for i in range(len(dimensions) - 1):
        layer_dims.append((dimensions[i], dimensions[i + 1]))
        tanh_flags.append(True)
    layer_dims.append((dimensions[-1], latent_dim))
    tanh_flags.append(False)
    # decoder: Linear(latent, dr[0]) (no act), then Linear(+Tanh except last)
    dr = dimensions[::-1]
    layer_dims.append((latent_dim, dr[0]))
    tanh_flags.append(False)
    for i in range(len(dr) - 1):
        layer_dims.append((dr[i], dr[i + 1]))
        tanh_flags.append(i < len(dr) - 2)
    # estimation: Linear+Tanh (+Dropout, identity at eval), Linear, Softmax
    layer_dims.append((latent_dim + 2, estimation_hidden_size))
    tanh_flags.append(True)
    layer_dims.append((estimation_hidden_size, n_gmm))
    tanh_flags.append(False)
    return layer_dims, tanh_flags


def pack_dagmm_params(params, dimensions, latent_dim, estimation_hidden_size, n_gmm):
    """Pack flat [W0,b0,W1,b1,...] into one sublane-padded f32 slab (done once).

    Layer i occupies rows [off_i, off_i + round_up(out_i, 8)); W_i lives in
    columns [0, in_i) and b_i in column in_i.  Returns (packed, row_offsets).
    """
    layer_dims, _ = _layer_structure(dimensions, latent_dim,
                                     estimation_hidden_size, n_gmm)
    assert len(params) == 2 * len(layer_dims)
    width = _round_up(max(fi for fi, _ in layer_dims) + 1, 128)
    blocks, offsets, r = [], [], 0
    for li, (fi, fo) in enumerate(layer_dims):
        w = params[2 * li].astype(jnp.float32)                 # (fo, fi)
        b = params[2 * li + 1].astype(jnp.float32).reshape(fo, 1)
        fo_pad = _round_up(fo, 8)
        blk = jnp.zeros((fo_pad, width), jnp.float32)
        blk = blk.at[:fo, :fi].set(w)
        blk = blk.at[:fo, fi:fi + 1].set(b)
        blocks.append(blk)
        offsets.append(r)
        r += fo_pad
    return jnp.concatenate(blocks, axis=0), tuple(offsets)


def _dagmm_kernel(layer_dims, tanh_flags, row_offs, latent_dim, n_enc, n_dec,
                  x_ref, p_ref, reconst_ref, latents_ref, gamma_ref):
    f32 = jnp.float32
    D = layer_dims[0][0]

    def wb(li):
        fi, fo = layer_dims[li]
        r0 = row_offs[li]
        return p_ref[r0:r0 + fo, 0:fi], p_ref[r0:r0 + fo, fi:fi + 1]

    def dot_t(a, b):          # (m, k) x (n, k) -> (m, n) on the MXU
        return lax.dot_general(a, b, (((1,), (1,)), ((), ())),
                               preferred_element_type=f32)

    def linear(h, li):
        w, b = wb(li)
        y = jnp.dot(w, h, preferred_element_type=f32) + b
        return jnp.tanh(y) if tanh_flags[li] else y

    # ---- encoder ----------------------------------------------------------
    # Layer 0 consumes x in its natural (tb, D) layout via a transposed-rhs
    # matmul, so the wrapper never transposes x.  Batch sits on lanes from
    # here on (lane-dense activations and outputs).
    x_nat = x_ref[...].astype(f32)                          # (tb, D)
    w0, b0 = wb(0)
    h = dot_t(w0, x_nat) + b0                               # (out0, tb)
    if tanh_flags[0]:
        h = jnp.tanh(h)
    li = 1
    for _ in range(n_enc - 1):
        h = linear(h, li)
        li += 1
    enc = h                                                 # (latent, tb)

    # ---- decoder ----------------------------------------------------------
    for _ in range(n_dec):
        h = linear(h, li)
        li += 1
    reconst = h                                             # (D, tb)
    reconst_ref[...] = reconst.astype(reconst_ref.dtype)

    # ---- reconstruction features -------------------------------------------
    # x^T is materialized only here (identity matmul on the MXU) to keep its
    # live range short; x_ref's tile is already VMEM-resident.
    x_t = dot_t(jnp.eye(D, dtype=f32), x_ref[...].astype(f32))     # (D, tb)
    diff = x_t - reconst
    diff_nrm = jnp.sqrt(jnp.sum(diff * diff, axis=0, keepdims=True))  # (1, tb)
    x_nrm = jnp.sqrt(jnp.sum(x_t * x_t, axis=0, keepdims=True))
    r_nrm = jnp.sqrt(jnp.sum(reconst * reconst, axis=0, keepdims=True))
    dot_xr = jnp.sum(x_t * reconst, axis=0, keepdims=True)

    rec_euc = diff_nrm * pl.reciprocal(jnp.maximum(x_nrm, EPSILON), approx=True)
    rec_cos = dot_xr * pl.reciprocal(
        jnp.maximum(x_nrm, COSINE_EPS) * jnp.maximum(r_nrm, COSINE_EPS),
        approx=True)

    # latents output: lane-dense stores, never re-read inside the kernel.
    latents_ref[0:latent_dim, :] = enc.astype(latents_ref.dtype)
    latents_ref[latent_dim:latent_dim + 1, :] = rec_euc.astype(latents_ref.dtype)
    latents_ref[latent_dim + 1:latent_dim + 2, :] = rec_cos.astype(latents_ref.dtype)

    # ---- estimation network -------------------------------------------------
    # First layer's weight is split column-wise so no concat / reload of the
    # latents is needed: h = W_enc @ enc + w_euc*rec_euc + w_cos*rec_cos + b.
    fi1, fo1 = layer_dims[li]
    r0 = row_offs[li]
    w_enc = p_ref[r0:r0 + fo1, 0:latent_dim]
    w_euc = p_ref[r0:r0 + fo1, latent_dim:latent_dim + 1]
    w_cos = p_ref[r0:r0 + fo1, latent_dim + 1:latent_dim + 2]
    b1 = p_ref[r0:r0 + fo1, fi1:fi1 + 1]
    h = (jnp.dot(w_enc, enc, preferred_element_type=f32)
         + w_euc * rec_euc + w_cos * rec_cos + b1)
    h = jnp.tanh(h)
    li += 1
    # TODO(synk): nn.Dropout(p=0.5) after this tanh is identity in eval mode; omitted.
    logits = linear(h, li)                                  # (n_gmm, tb)
    m = jnp.max(logits, axis=0, keepdims=True)              # stable softmax
    e = jnp.exp(logits - m)
    gamma = e * pl.reciprocal(jnp.sum(e, axis=0, keepdims=True), approx=True)
    gamma_ref[...] = gamma.astype(gamma_ref.dtype)


def _choose_tile(b_pad, max_tile_b):
    """Prefer 2 grid steps (one per TensorCore on v7x; ~0.35us extra on 1-TC
    chips), one step for tiny batches, else the largest 128-multiple divisor
    of b_pad that is <= max_tile_b."""
    max_tile_b = max(128, (max_tile_b // 128) * 128)
    half = b_pad // 2
    if 128 <= half <= max_tile_b and half % 128 == 0:
        return half
    if b_pad <= max_tile_b:
        return b_pad
    tb = max_tile_b
    while b_pad % tb:
        tb -= 128
    return tb


def dagmm_forward(x, packed_params, row_offsets, dimensions, latent_dim,
                  estimation_hidden_size, n_gmm, max_tile_b=2048,
                  vmem_limit_bytes=32 * 1024 * 1024):
    """Pallas DAGMM forward. Returns (reconst [B,D], latents [B,latent+2], gamma [B,K])."""
    B, D = x.shape
    assert D == dimensions[0]
    layer_dims, tanh_flags = _layer_structure(
        dimensions, latent_dim, estimation_hidden_size, n_gmm)
    n_enc = n_dec = len(dimensions)

    x = x.astype(jnp.float32)
    b_pad = _round_up(B, 128)
    if b_pad != B:          # zero rows flow through safely (eps clamps); sliced off below
        x = jnp.pad(x, ((0, b_pad - B), (0, 0)))
    tb = _choose_tile(b_pad, max_tile_b)
    grid = (b_pad // tb,)

    k_total = latent_dim + 2
    out_shape = (
        jax.ShapeDtypeStruct((D, b_pad), jnp.float32),
        jax.ShapeDtypeStruct((k_total, b_pad), jnp.float32),
        jax.ShapeDtypeStruct((n_gmm, b_pad), jnp.float32),
    )
    out_specs = (
        pl.BlockSpec((D, tb), lambda i: (0, i)),
        pl.BlockSpec((k_total, tb), lambda i: (0, i)),
        pl.BlockSpec((n_gmm, tb), lambda i: (0, i)),
    )

    # Advisory cost estimate so XLA can schedule/overlap the custom call.
    flops = 2 * b_pad * (sum(fi * fo for fi, fo in layer_dims) + D * D)
    transcendentals = b_pad * (
        sum(fo for (_, fo), t in zip(layer_dims, tanh_flags) if t) + n_gmm)
    bytes_accessed = 4 * (int(x.size) + int(packed_params.size)
                          + sum(int(np.prod(s.shape)) for s in out_shape))
    cost = pl.CostEstimate(flops=flops, transcendentals=transcendentals,
                           bytes_accessed=bytes_accessed)

    kernel = functools.partial(_dagmm_kernel, tuple(layer_dims), tuple(tanh_flags),
                               tuple(row_offsets), latent_dim, n_enc, n_dec)

    def build(single_buffer_params):
        param_kwargs = (
            dict(pipeline_mode=pl.Buffered(1)) if single_buffer_params else {})
        in_specs = [
            pl.BlockSpec((tb, D), lambda i: (i, 0)),
            # Constant index map: the packed parameter slab stays resident.
            pl.BlockSpec(packed_params.shape, lambda i: (0, 0), **param_kwargs),
        ]
        return pl.pallas_call(
            kernel,
            grid=grid,
            in_specs=in_specs,
            out_specs=out_specs,
            out_shape=out_shape,
            compiler_params=pltpu.CompilerParams(
                dimension_semantics=("parallel",),
                vmem_limit_bytes=vmem_limit_bytes),
            cost_estimate=cost,
        )

    try:
        # Single-buffer the resident parameter slab (its block index never changes).
        outs = jax.block_until_ready(build(True)(x, packed_params))
    except Exception:
        # Some Pallas versions reject pl.Buffered(1); fall back to the default
        # double-buffered spec (identical semantics, ~50 KiB extra VMEM).
        outs = build(False)(x, packed_params)

    reconst_t, latents_t, gamma_t = outs
    # Tiny layout transposes back to the PyTorch [B, *] convention.
    return reconst_t.T[:B], latents_t.T[:B], gamma_t.T[:B]


def make_dagmm_params(key, dimensions, latent_dim, estimation_hidden_size, n_gmm,
                      dtype=jnp.float32):
    """PyTorch-Linear-style init. Returns flat [W0, b0, W1, b1, ...]; W is (out,in), b is (out,1)."""
    layer_dims, _ = _layer_structure(dimensions, latent_dim,
                                     estimation_hidden_size, n_gmm)
    params = []
    for fan_in, fan_out in layer_dims:
        key, kw, kb = jax.random.split(key, 3)
        bound = 1.0 / float(np.sqrt(fan_in))
        params.append(jax.random.uniform(kw, (fan_out, fan_in), dtype, -bound, bound))
        params.append(jax.random.uniform(kb, (fan_out, 1), dtype, -bound, bound))
    return params


def _reference_forward(x, params, dimensions, latent_dim, estimation_hidden_size, n_gmm):
    """Pure-JAX reference matching the PyTorch DAGMM.forward semantics (eval mode)."""
    layer_dims, tanh_flags = _layer_structure(
        dimensions, latent_dim, estimation_hidden_size, n_gmm)
    n_enc = n_dec = len(dimensions)

    def linear(h, li, apply_tanh):
        w, b = params[2 * li], params[2 * li + 1]
        y = h @ w.T + b[:, 0]
        return jnp.tanh(y) if apply_tanh else y

    h = x.astype(jnp.float32)
    li = 0
    for _ in range(n_enc):
        h = linear(h, li, tanh_flags[li]); li += 1
    enc = h
    for _ in range(n_dec):
        h = linear(h, li, tanh_flags[li]); li += 1
    reconst = h

    x_nrm = jnp.linalg.norm(x, axis=1)
    r_nrm = jnp.linalg.norm(reconst, axis=1)
    rec_euc = jnp.linalg.norm(x - reconst, axis=1) / jnp.maximum(x_nrm, EPSILON)
    rec_cos = jnp.sum(x * reconst, axis=1) / (
        jnp.maximum(x_nrm, COSINE_EPS) * jnp.maximum(r_nrm, COSINE_EPS))
    latents = jnp.concatenate([enc, rec_euc[:, None], rec_cos[:, None]], axis=1)

    h = linear(latents, li, tanh_flags[li]); li += 1
    logits = linear(h, li, tanh_flags[li]); li += 1
    gamma = jax.nn.softmax(logits, axis=1)
    return reconst, latents, gamma


if __name__ == "__main__":
    # Small DAGMM config (tabular anomaly-detection sizes).
    dimensions = [32, 16, 8]        # input dim 32, encoder hidden dims
    latent_dim = 2
    estimation_hidden_size = 8
    n_gmm = 4
    batch = 256                     # multiple of 128: no padding, 2 tiles of 128

    key = jax.random.PRNGKey(0)
    kp, kx = jax.random.split(key)
    params = make_dagmm_params(kp, dimensions, latent_dim,
                               estimation_hidden_size, n_gmm)
    x = jax.random.normal(kx, (batch, dimensions[0]), dtype=jnp.float32)

    # Pack parameters once (pure function of the weights).
    packed, row_offsets = pack_dagmm_params(
        params, dimensions, latent_dim, estimation_hidden_size, n_gmm)

    reconst, latents, gamma = dagmm_forward(
        x, packed, row_offsets, dimensions, latent_dim,
        estimation_hidden_size, n_gmm)
    jax.block_until_ready((reconst, latents, gamma))

    assert reconst.shape == (batch, dimensions[0])
    assert latents.shape == (batch, latent_dim + 2)
    assert gamma.shape == (batch, n_gmm)

    ref_reconst, ref_latents, ref_gamma = _reference_forward(
        x, params, dimensions, latent_dim, estimation_hidden_size, n_gmm)
    np.testing.assert_allclose(np.asarray(reconst), np.asarray(ref_reconst),
                               rtol=2e-2, atol=2e-2)
    np.testing.assert_allclose(np.asarray(latents), np.asarray(ref_latents),
                               rtol=2e-2, atol=2e-2)
    np.testing.assert_allclose(np.asarray(gamma), np.asarray(ref_gamma),
                               rtol=2e-2, atol=2e-2)

    print("KERNEL_OK")
</pallas_src>

<mosaic_0001>
module attributes {stable_mosaic.version = 11 : i64} {
  func.func @_dagmm_kernel(%arg0: i32, %arg1: memref<128x32xf32, #tpu.memory_space<vmem>>, %arg2: memref<104x128xf32, #tpu.memory_space<vmem>>, %arg3: memref<32x128xf32, #tpu.memory_space<vmem>>, %arg4: memref<4x128xf32, #tpu.memory_space<vmem>>, %arg5: memref<4x128xf32, #tpu.memory_space<vmem>>) attributes {dimension_semantics = [#tpu.dimension_semantics<parallel>], iteration_bounds = array<i64: 2>, scalar_prefetch = 0 : i64, scratch_operands = 0 : i64, tpu.core_type = #tpu.core_type<tc>, window_params = [{transform_indices = @transform_0, window_bounds = array<i64: 128, 32>}, {pipeline_mode = #tpu.pipeline_mode<synchronous>, transform_indices = @transform_1, window_bounds = array<i64: 104, 128>}, {transform_indices = @transform_2, window_bounds = array<i64: 32, 128>}, {transform_indices = @transform_3, window_bounds = array<i64: 4, 128>}, {transform_indices = @transform_4, window_bounds = array<i64: 4, 128>}]} {
    %c0 = arith.constant 0 : index
    %c0_0 = arith.constant 0 : index
    %0 = vector.load %arg1[%c0, %c0_0] : memref<128x32xf32, #tpu.memory_space<vmem>>, vector<128x32xf32>
    %c0_1 = arith.constant 0 : index
    %c0_2 = arith.constant 0 : index
    %1 = vector.load %arg2[%c0_1, %c0_2] : memref<104x128xf32, #tpu.memory_space<vmem>>, vector<16x32xf32>
    %c0_3 = arith.constant 0 : index
    %c32 = arith.constant 32 : index
    %2 = vector.load %arg2[%c0_3, %c32] : memref<104x128xf32, #tpu.memory_space<vmem>>, vector<16x1xf32>
    %cst = arith.constant dense<0.000000e+00> : vector<16x128xf32>
    %3 = tpu.matmul %1, %0, %cst {dimension_numbers = #tpu.dot_dimension_numbers<[1], [1], [0], [0], [0, 0, 1, 0], [], []>} : vector<16x32xf32>, vector<128x32xf32>, vector<16x128xf32> -> vector<16x128xf32>
    %4 = vector.broadcast %2 : vector<16x1xf32> to vector<16x128xf32>
    %5 = arith.addf %3, %4 : vector<16x128xf32>
    %6 = math.tanh %5 : vector<16x128xf32>
    %c16 = arith.constant 16 : index
    %c0_4 = arith.constant 0 : index
    %7 = vector.load %arg2[%c16, %c0_4] : memref<104x128xf32, #tpu.memory_space<vmem>>, vector<8x16xf32>
    %c16_5 = arith.constant 16 : index
    %c16_6 = arith.constant 16 : index
    %8 = vector.load %arg2[%c16_5, %c16_6] : memref<104x128xf32, #tpu.memory_space<vmem>>, vector<8x1xf32>
    %cst_7 = arith.constant dense<0.000000e+00> : vector<8x128xf32>
    %9 = tpu.matmul %7, %6, %cst_7 {dimension_numbers = #tpu.dot_dimension_numbers<[1], [0], [0], [1], [0, 0, 1, 1], [], []>} : vector<8x16xf32>, vector<16x128xf32>, vector<8x128xf32> -> vector<8x128xf32>
    %10 = vector.broadcast %8 : vector<8x1xf32> to vector<8x128xf32>
    %11 = arith.addf %9, %10 : vector<8x128xf32>
    %12 = math.tanh %11 : vector<8x128xf32>
    %c24 = arith.constant 24 : index
    %c0_8 = arith.constant 0 : index
    %13 = vector.load %arg2[%c24, %c0_8] : memref<104x128xf32, #tpu.memory_space<vmem>>, vector<2x8xf32>
    %c24_9 = arith.constant 24 : index
    %c8 = arith.constant 8 : index
    %14 = vector.load %arg2[%c24_9, %c8] : memref<104x128xf32, #tpu.memory_space<vmem>>, vector<2x1xf32>
    %cst_10 = arith.constant dense<0.000000e+00> : vector<2x128xf32>
    %15 = tpu.matmul %13, %12, %cst_10 {dimension_numbers = #tpu.dot_dimension_numbers<[1], [0], [0], [1], [0, 0, 1, 1], [], []>} : vector<2x8xf32>, vector<8x128xf32>, vector<2x128xf32> -> vector<2x128xf32>
    %16 = vector.broadcast %14 : vector<2x1xf32> to vector<2x128xf32>
    %17 = arith.addf %15, %16 : vector<2x128xf32>
    %c32_11 = arith.constant 32 : index
    %c0_12 = arith.constant 0 : index
    %18 = vector.load %arg2[%c32_11, %c0_12] : memref<104x128xf32, #tpu.memory_space<vmem>>, vector<8x2xf32>
    %c32_13 = arith.constant 32 : index
    %c2 = arith.constant 2 : index
    %19 = vector.load %arg2[%c32_13, %c2] : memref<104x128xf32, #tpu.memory_space<vmem>>, vector<8x1xf32>
    %cst_14 = arith.constant dense<0.000000e+00> : vector<8x128xf32>
    %20 = tpu.matmul %18, %17, %cst_14 {dimension_numbers = #tpu.dot_dimension_numbers<[1], [0], [0], [1], [0, 0, 1, 1], [], []>} : vector<8x2xf32>, vector<2x128xf32>, vector<8x128xf32> -> vector<8x128xf32>
    %21 = vector.broadcast %19 : vector<8x1xf32> to vector<8x128xf32>
    %22 = arith.addf %20, %21 : vector<8x128xf32>
    %c40 = arith.constant 40 : index
    %c0_15 = arith.constant 0 : index
    %23 = vector.load %arg2[%c40, %c0_15] : memref<104x128xf32, #tpu.memory_space<vmem>>, vector<16x8xf32>
    %c40_16 = arith.constant 40 : index
    %c8_17 = arith.constant 8 : index
    %24 = vector.load %arg2[%c40_16, %c8_17] : memref<104x128xf32, #tpu.memory_space<vmem>>, vector<16x1xf32>
    %cst_18 = arith.constant dense<0.000000e+00> : vector<16x128xf32>
    %25 = tpu.matmul %23, %22, %cst_18 {dimension_numbers = #tpu.dot_dimension_numbers<[1], [0], [0], [1], [0, 0, 1, 1], [], []>} : vector<16x8xf32>, vector<8x128xf32>, vector<16x128xf32> -> vector<16x128xf32>
    %26 = vector.broadcast %24 : vector<16x1xf32> to vector<16x128xf32>
    %27 = arith.addf %25, %26 : vector<16x128xf32>
    %28 = math.tanh %27 : vector<16x128xf32>
    %c56 = arith.constant 56 : index
    %c0_19 = arith.constant 0 : index
    %29 = vector.load %arg2[%c56, %c0_19] : memref<104x128xf32, #tpu.memory_space<vmem>>, vector<32x16xf32>
    %c56_20 = arith.constant 56 : index
    %c16_21 = arith.constant 16 : index
    %30 = vector.load %arg2[%c56_20, %c16_21] : memref<104x128xf32, #tpu.memory_space<vmem>>, vector<32x1xf32>
    %cst_22 = arith.constant dense<0.000000e+00> : vector<32x128xf32>
    %31 = tpu.matmul %29, %28, %cst_22 {dimension_numbers = #tpu.dot_dimension_numbers<[1], [0], [0], [1], [0, 0, 1, 1], [], []>} : vector<32x16xf32>, vector<16x128xf32>, vector<32x128xf32> -> vector<32x128xf32>
    %32 = vector.broadcast %30 : vector<32x1xf32> to vector<32x128xf32>
    %33 = arith.addf %31, %32 : vector<32x128xf32>
    %c0_23 = arith.constant 0 : index
    %c0_24 = arith.constant 0 : index
    %34 = vector.load %arg3[%c0_23, %c0_24] : memref<32x128xf32, #tpu.memory_space<vmem>>, vector<32x128xf32>
    tpu.vector_store %arg3[%c0_23, %c0_24], %33 {strides = array<i32>} : memref<32x128xf32, #tpu.memory_space<vmem>>, vector<32x128xf32>,
    %35 = tpu.iota {dimensions = array<i32: 0>} : vector<32x32xi32>
    %36 = tpu.iota {dimensions = array<i32: 1>} : vector<32x32xi32>
    %c0_i32 = arith.constant 0 : i32
    %37 = vector.broadcast %c0_i32 : i32 to vector<32x32xi32>
    %38 = arith.addi %35, %37 : vector<32x32xi32>
    %39 = arith.cmpi eq, %38, %36 : vector<32x32xi32>
    %40 = arith.extui %39 : vector<32x32xi1> to vector<32x32xi32>
    %41 = arith.sitofp %40 : vector<32x32xi32> to vector<32x32xf32>
    %c0_25 = arith.constant 0 : index
    %c0_26 = arith.constant 0 : index
    %42 = vector.load %arg1[%c0_25, %c0_26] : memref<128x32xf32, #tpu.memory_space<vmem>>, vector<128x32xf32>
    %cst_27 = arith.constant dense<0.000000e+00> : vector<32x128xf32>
    %43 = tpu.matmul %41, %42, %cst_27 {dimension_numbers = #tpu.dot_dimension_numbers<[1], [1], [0], [0], [0, 0, 1, 0], [], []>} : vector<32x32xf32>, vector<128x32xf32>, vector<32x128xf32> -> vector<32x128xf32>
    %44 = arith.subf %43, %33 : vector<32x128xf32>
    %45 = arith.mulf %44, %44 : vector<32x128xf32>
    %cst_28 = arith.constant dense<0.000000e+00> : vector<128xf32>
    %46 = vector.multi_reduction <add>, %45, %cst_28 [0] : vector<32x128xf32> to vector<128xf32>
    %47 = vector.shape_cast %46 : vector<128xf32> to vector<1x128xf32>
    %48 = math.sqrt %47 : vector<1x128xf32>
    %49 = arith.mulf %43, %43 : vector<32x128xf32>
    %cst_29 = arith.constant dense<0.000000e+00> : vector<128xf32>
    %50 = vector.multi_reduction <add>, %49, %cst_29 [0] : vector<32x128xf32> to vector<128xf32>
    %51 = vector.shape_cast %50 : vector<128xf32> to vector<1x128xf32>
    %52 = math.sqrt %51 : vector<1x128xf32>
    %53 = arith.mulf %33, %33 : vector<32x128xf32>
    %cst_30 = arith.constant dense<0.000000e+00> : vector<128xf32>
    %54 = vector.multi_reduction <add>, %53, %cst_30 [0] : vector<32x128xf32> to vector<128xf32>
    %55 = vector.shape_cast %54 : vector<128xf32> to vector<1x128xf32>
    %56 = math.sqrt %55 : vector<1x128xf32>
    %57 = arith.mulf %43, %33 : vector<32x128xf32>
    %cst_31 = arith.constant dense<0.000000e+00> : vector<128xf32>
    %58 = vector.multi_reduction <add>, %57, %cst_31 [0] : vector<32x128xf32> to vector<128xf32>
    %59 = vector.shape_cast %58 : vector<128xf32> to vector<1x128xf32>
    %cst_32 = arith.constant 1.1920929E-7 : f32
    %60 = vector.broadcast %cst_32 : f32 to vector<1x128xf32>
    %61 = arith.maximumf %52, %60 : vector<1x128xf32>
    %62 = tpu.reciprocal %61 {approx = true} : vector<1x128xf32> -> vector<1x128xf32>
    %63 = arith.mulf %48, %62 : vector<1x128xf32>
    %cst_33 = arith.constant 9.99999993E-9 : f32
    %64 = vector.broadcast %cst_33 : f32 to vector<1x128xf32>
    %65 = arith.maximumf %52, %64 : vector<1x128xf32>
    %cst_34 = arith.constant 9.99999993E-9 : f32
    %66 = vector.broadcast %cst_34 : f32 to vector<1x128xf32>
    %67 = arith.maximumf %56, %66 : vector<1x128xf32>
    %68 = arith.mulf %65, %67 : vector<1x128xf32>
    %69 = tpu.reciprocal %68 {approx = true} : vector<1x128xf32> -> vector<1x128xf32>
    %70 = arith.mulf %59, %69 : vector<1x128xf32>
    %c0_35 = arith.constant 0 : index
    %c0_36 = arith.constant 0 : index
    %71 = vector.load %arg4[%c0_35, %c0_36] : memref<4x128xf32, #tpu.memory_space<vmem>>, vector<2x128xf32>
    tpu.vector_store %arg4[%c0_35, %c0_36], %17 {strides = array<i32>} : memref<4x128xf32, #tpu.memory_space<vmem>>, vector<2x128xf32>,
    %c2_37 = arith.constant 2 : index
    %c0_38 = arith.constant 0 : index
    %72 = vector.load %arg4[%c2_37, %c0_38] : memref<4x128xf32, #tpu.memory_space<vmem>>, vector<1x128xf32>
    tpu.vector_store %arg4[%c2_37, %c0_38], %63 {strides = array<i32>} : memref<4x128xf32, #tpu.memory_space<vmem>>, vector<1x128xf32>,
    %c3 = arith.constant 3 : index
    %c0_39 = arith.constant 0 : index
    %73 = vector.load %arg4[%c3, %c0_39] : memref<4x128xf32, #tpu.memory_space<vmem>>, vector<1x128xf32>
    tpu.vector_store %arg4[%c3, %c0_39], %70 {strides = array<i32>} : memref<4x128xf32, #tpu.memory_space<vmem>>, vector<1x128xf32>,
    %c88 = arith.constant 88 : index
    %c0_40 = arith.constant 0 : index
    %74 = vector.load %arg2[%c88, %c0_40] : memref<104x128xf32, #tpu.memory_space<vmem>>, vector<8x2xf32>
    %c88_41 = arith.constant 88 : index
    %c2_42 = arith.constant 2 : index
    %75 = vector.load %arg2[%c88_41, %c2_42] : memref<104x128xf32, #tpu.memory_space<vmem>>, vector<8x1xf32>
    %c88_43 = arith.constant 88 : index
    %c3_44 = arith.constant 3 : index
    %76 = vector.load %arg2[%c88_43, %c3_44] : memref<104x128xf32, #tpu.memory_space<vmem>>, vector<8x1xf32>
    %c88_45 = arith.constant 88 : index
    %c4 = arith.constant 4 : index
    %77 = vector.load %arg2[%c88_45, %c4] : memref<104x128xf32, #tpu.memory_space<vmem>>, vector<8x1xf32>
    %cst_46 = arith.constant dense<0.000000e+00> : vector<8x128xf32>
    %78 = tpu.matmul %74, %17, %cst_46 {dimension_numbers = #tpu.dot_dimension_numbers<[1], [0], [0], [1], [0, 0, 1, 1], [], []>} : vector<8x2xf32>, vector<2x128xf32>, vector<8x128xf32> -> vector<8x128xf32>
    %79 = vector.broadcast %75 : vector<8x1xf32> to vector<8x128xf32>
    %80 = vector.broadcast %63 : vector<1x128xf32> to vector<8x128xf32>
    %81 = arith.mulf %79, %80 : vector<8x128xf32>
    %82 = arith.addf %78, %81 : vector<8x128xf32>
    %83 = vector.broadcast %76 : vector<8x1xf32> to vector<8x128xf32>
    %84 = vector.broadcast %70 : vector<1x128xf32> to vector<8x128xf32>
    %85 = arith.mulf %83, %84 : vector<8x128xf32>
    %86 = arith.addf %82, %85 : vector<8x128xf32>
    %87 = vector.broadcast %77 : vector<8x1xf32> to vector<8x128xf32>
    %88 = arith.addf %86, %87 : vector<8x128xf32>
    %89 = math.tanh %88 : vector<8x128xf32>
    %c96 = arith.constant 96 : index
    %c0_47 = arith.constant 0 : index
    %90 = vector.load %arg2[%c96, %c0_47] : memref<104x128xf32, #tpu.memory_space<vmem>>, vector<4x8xf32>
    %c96_48 = arith.constant 96 : index
    %c8_49 = arith.constant 8 : index
    %91 = vector.load %arg2[%c96_48, %c8_49] : memref<104x128xf32, #tpu.memory_space<vmem>>, vector<4x1xf32>
    %cst_50 = arith.constant dense<0.000000e+00> : vector<4x128xf32>
    %92 = tpu.matmul %90, %89, %cst_50 {dimension_numbers = #tpu.dot_dimension_numbers<[1], [0], [0], [1], [0, 0, 1, 1], [], []>} : vector<4x8xf32>, vector<8x128xf32>, vector<4x128xf32> -> vector<4x128xf32>
    %93 = vector.broadcast %91 : vector<4x1xf32> to vector<4x128xf32>
    %94 = arith.addf %92, %93 : vector<4x128xf32>
    %cst_51 = arith.constant dense<0xFF800000> : vector<128xf32>
    %95 = vector.multi_reduction <maximumf>, %94, %cst_51 [0] : vector<4x128xf32> to vector<128xf32>
    %96 = vector.shape_cast %95 : vector<128xf32> to vector<1x128xf32>
    %97 = vector.broadcast %96 : vector<1x128xf32> to vector<4x128xf32>
    %98 = arith.subf %94, %97 : vector<4x128xf32>
    %99 = math.exp %98 : vector<4x128xf32>
    %cst_52 = arith.constant dense<0.000000e+00> : vector<128xf32>
    %100 = vector.multi_reduction <add>, %99, %cst_52 [0] : vector<4x128xf32> to vector<128xf32>
    %101 = vector.shape_cast %100 : vector<128xf32> to vector<1x128xf32>
    %102 = tpu.reciprocal %101 {approx = true} : vector<1x128xf32> -> vector<1x128xf32>
    %103 = vector.broadcast %102 : vector<1x128xf32> to vector<4x128xf32>
    %104 = arith.mulf %99, %103 : vector<4x128xf32>
    %c0_53 = arith.constant 0 : index
    %c0_54 = arith.constant 0 : index
    %105 = vector.load %arg5[%c0_53, %c0_54] : memref<4x128xf32, #tpu.memory_space<vmem>>, vector<4x128xf32>
    tpu.vector_store %arg5[%c0_53, %c0_54], %104 {strides = array<i32>} : memref<4x128xf32, #tpu.memory_space<vmem>>, vector<4x128xf32>,
    return
  }
  func.func @transform_0(%arg0: i32) -> (i32, i32) {
    %c0_i32 = arith.constant 0 : i32
    %c0_i32_0 = arith.constant 0 : i32
    return %arg0, %c0_i32 : i32, i32
  }
  func.func @transform_1(%arg0: i32) -> (i32, i32) {
    %c0_i32 = arith.constant 0 : i32
    %c0_i32_0 = arith.constant 0 : i32
    %c0_i32_1 = arith.constant 0 : i32
    return %c0_i32, %c0_i32_0 : i32, i32
  }
  func.func @transform_2(%arg0: i32) -> (i32, i32) {
    %c0_i32 = arith.constant 0 : i32
    %c0_i32_0 = arith.constant 0 : i32
    return %c0_i32, %arg0 : i32, i32
  }
  func.func @transform_3(%arg0: i32) -> (i32, i32) {
    %c0_i32 = arith.constant 0 : i32
    %c0_i32_0 = arith.constant 0 : i32
    return %c0_i32, %arg0 : i32, i32
  }
  func.func @transform_4(%arg0: i32) -> (i32, i32) {
    %c0_i32 = arith.constant 0 : i32
    %c0_i32_0 = arith.constant 0 : i32
    return %c0_i32, %arg0 : i32, i32
  }
}

module attributes {stable_mosaic.version = 11 : i64} {
  func.func @_dagmm_kernel(%arg0: i32, %arg1: memref<128x32xf32, #tpu.memory_space<vmem>>, %arg2: memref<104x128xf32, #tpu.memory_space<vmem>>, %arg3: memref<32x128xf32, #tpu.memory_space<vmem>>, %arg4: memref<4x128xf32, #tpu.memory_space<vmem>>, %arg5: memref<4x128xf32, #tpu.memory_space<vmem>>) attributes {dimension_semantics = [#tpu.dimension_semantics<parallel>], iteration_bounds = array<i64: 2>, scalar_prefetch = 0 : i64, scratch_operands = 0 : i64, tpu.core_type = #tpu.core_type<tc>, window_params = [{transform_indices = @transform_0, window_bounds = array<i64: 128, 32>}, {pipeline_mode = #tpu.pipeline_mode<synchronous>, transform_indices = @transform_1, window_bounds = array<i64: 104, 128>}, {transform_indices = @transform_2, window_bounds = array<i64: 32, 128>}, {transform_indices = @transform_3, window_bounds = array<i64: 4, 128>}, {transform_indices = @transform_4, window_bounds = array<i64: 4, 128>}]} {
    %c0 = arith.constant 0 : index
    %c0_0 = arith.constant 0 : index
    %0 = vector.load %arg1[%c0, %c0_0] : memref<128x32xf32, #tpu.memory_space<vmem>>, vector<128x32xf32>
    %c0_1 = arith.constant 0 : index
    %c0_2 = arith.constant 0 : index
    %1 = vector.load %arg2[%c0_1, %c0_2] : memref<104x128xf32, #tpu.memory_space<vmem>>, vector<16x32xf32>
    %c0_3 = arith.constant 0 : index
    %c32 = arith.constant 32 : index
    %2 = vector.load %arg2[%c0_3, %c32] : memref<104x128xf32, #tpu.memory_space<vmem>>, vector<16x1xf32>
    %cst = arith.constant dense<0.000000e+00> : vector<16x128xf32>
    %3 = tpu.matmul %1, %0, %cst {dimension_numbers = #tpu.dot_dimension_numbers<[1], [1], [0], [0], [0, 0, 1, 0], [], []>} : vector<16x32xf32>, vector<128x32xf32>, vector<16x128xf32> -> vector<16x128xf32>
    %4 = vector.broadcast %2 : vector<16x1xf32> to vector<16x128xf32>
    %5 = arith.addf %3, %4 : vector<16x128xf32>
    %6 = math.tanh %5 : vector<16x128xf32>
    %c16 = arith.constant 16 : index
    %c0_4 = arith.constant 0 : index
    %7 = vector.load %arg2[%c16, %c0_4] : memref<104x128xf32, #tpu.memory_space<vmem>>, vector<8x16xf32>
    %c16_5 = arith.constant 16 : index
    %c16_6 = arith.constant 16 : index
    %8 = vector.load %arg2[%c16_5, %c16_6] : memref<104x128xf32, #tpu.memory_space<vmem>>, vector<8x1xf32>
    %cst_7 = arith.constant dense<0.000000e+00> : vector<8x128xf32>
    %9 = tpu.matmul %7, %6, %cst_7 {dimension_numbers = #tpu.dot_dimension_numbers<[1], [0], [0], [1], [0, 0, 1, 1], [], []>} : vector<8x16xf32>, vector<16x128xf32>, vector<8x128xf32> -> vector<8x128xf32>
    %10 = vector.broadcast %8 : vector<8x1xf32> to vector<8x128xf32>
    %11 = arith.addf %9, %10 : vector<8x128xf32>
    %12 = math.tanh %11 : vector<8x128xf32>
    %c24 = arith.constant 24 : index
    %c0_8 = arith.constant 0 : index
    %13 = vector.load %arg2[%c24, %c0_8] : memref<104x128xf32, #tpu.memory_space<vmem>>, vector<2x8xf32>
    %c24_9 = arith.constant 24 : index
    %c8 = arith.constant 8 : index
    %14 = vector.load %arg2[%c24_9, %c8] : memref<104x128xf32, #tpu.memory_space<vmem>>, vector<2x1xf32>
    %cst_10 = arith.constant dense<0.000000e+00> : vector<2x128xf32>
    %15 = tpu.matmul %13, %12, %cst_10 {dimension_numbers = #tpu.dot_dimension_numbers<[1], [0], [0], [1], [0, 0, 1, 1], [], []>} : vector<2x8xf32>, vector<8x128xf32>, vector<2x128xf32> -> vector<2x128xf32>
    %16 = vector.broadcast %14 : vector<2x1xf32> to vector<2x128xf32>
    %17 = arith.addf %15, %16 : vector<2x128xf32>
    %c32_11 = arith.constant 32 : index
    %c0_12 = arith.constant 0 : index
    %18 = vector.load %arg2[%c32_11, %c0_12] : memref<104x128xf32, #tpu.memory_space<vmem>>, vector<8x2xf32>
    %c32_13 = arith.constant 32 : index
    %c2 = arith.constant 2 : index
    %19 = vector.load %arg2[%c32_13, %c2] : memref<104x128xf32, #tpu.memory_space<vmem>>, vector<8x1xf32>
    %cst_14 = arith.constant dense<0.000000e+00> : vector<8x128xf32>
    %20 = tpu.matmul %18, %17, %cst_14 {dimension_numbers = #tpu.dot_dimension_numbers<[1], [0], [0], [1], [0, 0, 1, 1], [], []>} : vector<8x2xf32>, vector<2x128xf32>, vector<8x128xf32> -> vector<8x128xf32>
    %21 = vector.broadcast %19 : vector<8x1xf32> to vector<8x128xf32>
    %22 = arith.addf %20, %21 : vector<8x128xf32>
    %c40 = arith.constant 40 : index
    %c0_15 = arith.constant 0 : index
    %23 = vector.load %arg2[%c40, %c0_15] : memref<104x128xf32, #tpu.memory_space<vmem>>, vector<16x8xf32>
    %c40_16 = arith.constant 40 : index
    %c8_17 = arith.constant 8 : index
    %24 = vector.load %arg2[%c40_16, %c8_17] : memref<104x128xf32, #tpu.memory_space<vmem>>, vector<16x1xf32>
    %cst_18 = arith.constant dense<0.000000e+00> : vector<16x128xf32>
    %25 = tpu.matmul %23, %22, %cst_18 {dimension_numbers = #tpu.dot_dimension_numbers<[1], [0], [0], [1], [0, 0, 1, 1], [], []>} : vector<16x8xf32>, vector<8x128xf32>, vector<16x128xf32> -> vector<16x128xf32>
    %26 = vector.broadcast %24 : vector<16x1xf32> to vector<16x128xf32>
    %27 = arith.addf %25, %26 : vector<16x128xf32>
    %28 = math.tanh %27 : vector<16x128xf32>
    %c56 = arith.constant 56 : index
    %c0_19 = arith.constant 0 : index
    %29 = vector.load %arg2[%c56, %c0_19] : memref<104x128xf32, #tpu.memory_space<vmem>>, vector<32x16xf32>
    %c56_20 = arith.constant 56 : index
    %c16_21 = arith.constant 16 : index
    %30 = vector.load %arg2[%c56_20, %c16_21] : memref<104x128xf32, #tpu.memory_space<vmem>>, vector<32x1xf32>
    %cst_22 = arith.constant dense<0.000000e+00> : vector<32x128xf32>
    %31 = tpu.matmul %29, %28, %cst_22 {dimension_numbers = #tpu.dot_dimension_numbers<[1], [0], [0], [1], [0, 0, 1, 1], [], []>} : vector<32x16xf32>, vector<16x128xf32>, vector<32x128xf32> -> vector<32x128xf32>
    %32 = vector.broadcast %30 : vector<32x1xf32> to vector<32x128xf32>
    %33 = arith.addf %31, %32 : vector<32x128xf32>
    %c0_23 = arith.constant 0 : index
    %c0_24 = arith.constant 0 : index
    %34 = vector.load %arg3[%c0_23, %c0_24] : memref<32x128xf32, #tpu.memory_space<vmem>>, vector<32x128xf32>
    tpu.vector_store %arg3[%c0_23, %c0_24], %33 {strides = array<i32>} : memref<32x128xf32, #tpu.memory_space<vmem>>, vector<32x128xf32>,
    %35 = tpu.iota {dimensions = array<i32: 0>} : vector<32x32xi32>
    %36 = tpu.iota {dimensions = array<i32: 1>} : vector<32x32xi32>
    %c0_i32 = arith.constant 0 : i32
    %37 = vector.broadcast %c0_i32 : i32 to vector<32x32xi32>
    %38 = arith.addi %35, %37 : vector<32x32xi32>
    %39 = arith.cmpi eq, %38, %36 : vector<32x32xi32>
    %40 = arith.extui %39 : vector<32x32xi1> to vector<32x32xi32>
    %41 = arith.sitofp %40 : vector<32x32xi32> to vector<32x32xf32>
    %c0_25 = arith.constant 0 : index
    %c0_26 = arith.constant 0 : index
    %42 = vector.load %arg1[%c0_25, %c0_26] : memref<128x32xf32, #tpu.memory_space<vmem>>, vector<128x32xf32>
    %cst_27 = arith.constant dense<0.000000e+00> : vector<32x128xf32>
    %43 = tpu.matmul %41, %42, %cst_27 {dimension_numbers = #tpu.dot_dimension_numbers<[1], [1], [0], [0], [0, 0, 1, 0], [], []>} : vector<32x32xf32>, vector<128x32xf32>, vector<32x128xf32> -> vector<32x128xf32>
    %44 = arith.subf %43, %33 : vector<32x128xf32>
    %45 = arith.mulf %44, %44 : vector<32x128xf32>
    %cst_28 = arith.constant dense<0.000000e+00> : vector<128xf32>
    %46 = vector.multi_reduction <add>, %45, %cst_28 [0] : vector<32x128xf32> to vector<128xf32>
    %47 = vector.shape_cast %46 : vector<128xf32> to vector<1x128xf32>
    %48 = math.sqrt %47 : vector<1x128xf32>
    %49 = arith.mulf %43, %43 : vector<32x128xf32>
    %cst_29 = arith.constant dense<0.000000e+00> : vector<128xf32>
    %50 = vector.multi_reduction <add>, %49, %cst_29 [0] : vector<32x128xf32> to vector<128xf32>
    %51 = vector.shape_cast %50 : vector<128xf32> to vector<1x128xf32>
    %52 = math.sqrt %51 : vector<1x128xf32>
    %53 = arith.mulf %33, %33 : vector<32x128xf32>
    %cst_30 = arith.constant dense<0.000000e+00> : vector<128xf32>
    %54 = vector.multi_reduction <add>, %53, %cst_30 [0] : vector<32x128xf32> to vector<128xf32>
    %55 = vector.shape_cast %54 : vector<128xf32> to vector<1x128xf32>
    %56 = math.sqrt %55 : vector<1x128xf32>
    %57 = arith.mulf %43, %33 : vector<32x128xf32>
    %cst_31 = arith.constant dense<0.000000e+00> : vector<128xf32>
    %58 = vector.multi_reduction <add>, %57, %cst_31 [0] : vector<32x128xf32> to vector<128xf32>
    %59 = vector.shape_cast %58 : vector<128xf32> to vector<1x128xf32>
    %cst_32 = arith.constant 1.1920929E-7 : f32
    %60 = vector.broadcast %cst_32 : f32 to vector<1x128xf32>
    %61 = arith.maximumf %52, %60 : vector<1x128xf32>
    %62 = tpu.reciprocal %61 {approx = true} : vector<1x128xf32> -> vector<1x128xf32>
    %63 = arith.mulf %48, %62 : vector<1x128xf32>
    %cst_33 = arith.constant 9.99999993E-9 : f32
    %64 = vector.broadcast %cst_33 : f32 to vector<1x128xf32>
    %65 = arith.maximumf %52, %64 : vector<1x128xf32>
    %cst_34 = arith.constant 9.99999993E-9 : f32
    %66 = vector.broadcast %cst_34 : f32 to vector<1x128xf32>
    %67 = arith.maximumf %56, %66 : vector<1x128xf32>
    %68 = arith.mulf %65, %67 : vector<1x128xf32>
    %69 = tpu.reciprocal %68 {approx = true} : vector<1x128xf32> -> vector<1x128xf32>
    %70 = arith.mulf %59, %69 : vector<1x128xf32>
    %c0_35 = arith.constant 0 : index
    %c0_36 = arith.constant 0 : index
    %71 = vector.load %arg4[%c0_35, %c0_36] : memref<4x128xf32, #tpu.memory_space<vmem>>, vector<2x128xf32>
    tpu.vector_store %arg4[%c0_35, %c0_36], %17 {strides = array<i32>} : memref<4x128xf32, #tpu.memory_space<vmem>>, vector<2x128xf32>,
    %c2_37 = arith.constant 2 : index
    %c0_38 = arith.constant 0 : index
    %72 = vector.load %arg4[%c2_37, %c0_38] : memref<4x128xf32, #tpu.memory_space<vmem>>, vector<1x128xf32>
    tpu.vector_store %arg4[%c2_37, %c0_38], %63 {strides = array<i32>} : memref<4x128xf32, #tpu.memory_space<vmem>>, vector<1x128xf32>,
    %c3 = arith.constant 3 : index
    %c0_39 = arith.constant 0 : index
    %73 = vector.load %arg4[%c3, %c0_39] : memref<4x128xf32, #tpu.memory_space<vmem>>, vector<1x128xf32>
    tpu.vector_store %arg4[%c3, %c0_39], %70 {strides = array<i32>} : memref<4x128xf32, #tpu.memory_space<vmem>>, vector<1x128xf32>,
    %c88 = arith.constant 88 : index
    %c0_40 = arith.constant 0 : index
    %74 = vector.load %arg2[%c88, %c0_40] : memref<104x128xf32, #tpu.memory_space<vmem>>, vector<8x2xf32>
    %c88_41 = arith.constant 88 : index
    %c2_42 = arith.constant 2 : index
    %75 = vector.load %arg2[%c88_41, %c2_42] : memref<104x128xf32, #tpu.memory_space<vmem>>, vector<8x1xf32>
    %c88_43 = arith.constant 88 : index
    %c3_44 = arith.constant 3 : index
    %76 = vector.load %arg2[%c88_43, %c3_44] : memref<104x128xf32, #tpu.memory_space<vmem>>, vector<8x1xf32>
    %c88_45 = arith.constant 88 : index
    %c4 = arith.constant 4 : index
    %77 = vector.load %arg2[%c88_45, %c4] : memref<104x128xf32, #tpu.memory_space<vmem>>, vector<8x1xf32>
    %cst_46 = arith.constant dense<0.000000e+00> : vector<8x128xf32>
    %78 = tpu.matmul %74, %17, %cst_46 {dimension_numbers = #tpu.dot_dimension_numbers<[1], [0], [0], [1], [0, 0, 1, 1], [], []>} : vector<8x2xf32>, vector<2x128xf32>, vector<8x128xf32> -> vector<8x128xf32>
    %79 = vector.broadcast %75 : vector<8x1xf32> to vector<8x128xf32>
    %80 = vector.broadcast %63 : vector<1x128xf32> to vector<8x128xf32>
    %81 = arith.mulf %79, %80 : vector<8x128xf32>
    %82 = arith.addf %78, %81 : vector<8x128xf32>
    %83 = vector.broadcast %76 : vector<8x1xf32> to vector<8x128xf32>
    %84 = vector.broadcast %70 : vector<1x128xf32> to vector<8x128xf32>
    %85 = arith.mulf %83, %84 : vector<8x128xf32>
    %86 = arith.addf %82, %85 : vector<8x128xf32>
    %87 = vector.broadcast %77 : vector<8x1xf32> to vector<8x128xf32>
    %88 = arith.addf %86, %87 : vector<8x128xf32>
    %89 = math.tanh %88 : vector<8x128xf32>
    %c96 = arith.constant 96 : index
    %c0_47 = arith.constant 0 : index
    %90 = vector.load %arg2[%c96, %c0_47] : memref<104x128xf32, #tpu.memory_space<vmem>>, vector<4x8xf32>
    %c96_48 = arith.constant 96 : index
    %c8_49 = arith.constant 8 : index
    %91 = vector.load %arg2[%c96_48, %c8_49] : memref<104x128xf32, #tpu.memory_space<vmem>>, vector<4x1xf32>
    %cst_50 = arith.constant dense<0.000000e+00> : vector<4x128xf32>
    %92 = tpu.matmul %90, %89, %cst_50 {dimension_numbers = #tpu.dot_dimension_numbers<[1], [0], [0], [1], [0, 0, 1, 1], [], []>} : vector<4x8xf32>, vector<8x128xf32>, vector<4x128xf32> -> vector<4x128xf32>
    %93 = vector.broadcast %91 : vector<4x1xf32> to vector<4x128xf32>
    %94 = arith.addf %92, %93 : vector<4x128xf32>
    %cst_51 = arith.constant dense<0xFF800000> : vector<128xf32>
    %95 = vector.multi_reduction <maximumf>, %94, %cst_51 [0] : vector<4x128xf32> to vector<128xf32>
    %96 = vector.shape_cast %95 : vector<128xf32> to vector<1x128xf32>
    %97 = vector.broadcast %96 : vector<1x128xf32> to vector<4x128xf32>
    %98 = arith.subf %94, %97 : vector<4x128xf32>
    %99 = math.exp %98 : vector<4x128xf32>
    %cst_52 = arith.constant dense<0.000000e+00> : vector<128xf32>
    %100 = vector.multi_reduction <add>, %99, %cst_52 [0] : vector<4x128xf32> to vector<128xf32>
    %101 = vector.shape_cast %100 : vector<128xf32> to vector<1x128xf32>
    %102 = tpu.reciprocal %101 {approx = true} : vector<1x128xf32> -> vector<1x128xf32>
    %103 = vector.broadcast %102 : vector<1x128xf32> to vector<4x128xf32>
    %104 = arith.mulf %99, %103 : vector<4x128xf32>
    %c0_53 = arith.constant 0 : index
    %c0_54 = arith.constant 0 : index
    %105 = vector.load %arg5[%c0_53, %c0_54] : memref<4x128xf32, #tpu.memory_space<vmem>>, vector<4x128xf32>
    tpu.vector_store %arg5[%c0_53, %c0_54], %104 {strides = array<i32>} : memref<4x128xf32, #tpu.memory_space<vmem>>, vector<4x128xf32>,
    return
  }
  func.func @transform_0(%arg0: i32) -> (i32, i32) {
    %c0_i32 = arith.constant 0 : i32
    %c0_i32_0 = arith.constant 0 : i32
    return %arg0, %c0_i32 : i32, i32
  }
  func.func @transform_1(%arg0: i32) -> (i32, i32) {
    %c0_i32 = arith.constant 0 : i32
    %c0_i32_0 = arith.constant 0 : i32
    %c0_i32_1 = arith.constant 0 : i32
    return %c0_i32, %c0_i32_0 : i32, i32
  }
  func.func @transform_2(%arg0: i32) -> (i32, i32) {
    %c0_i32 = arith.constant 0 : i32
    %c0_i32_0 = arith.constant 0 : i32
    return %c0_i32, %arg0 : i32, i32
  }
  func.func @transform_3(%arg0: i32) -> (i32, i32) {
    %c0_i32 = arith.constant 0 : i32
    %c0_i32_0 = arith.constant 0 : i32
    return %c0_i32, %arg0 : i32, i32
  }
  func.func @transform_4(%arg0: i32) -> (i32, i32) {
    %c0_i32 = arith.constant 0 : i32
    %c0_i32_0 = arith.constant 0 : i32
    return %c0_i32, %arg0 : i32, i32
  }
}

</mosaic_0001>

<bundles_post_ra>
// kernel: tpu_custom_call.1
= control target key start
LH: loop header
LB: loop body
LE: loop exit
PB: predicated region body
PF: predicated region fallthrough
CT: control target
= control target key end

     0   :  { %10 = vsyncpa [#allocation3], 0  ;;  %s2479_s0 = inlined_call_operand.vmem [shape: f32[256,32], index: 0, kind: input, shape index: {}]   ;;  %s2480_s1 = inlined_call_operand.vmem [shape: f32[104,128], index: 1, kind: input, shape index: {}]   ;;  %s2481_s2 = inlined_call_operand.hbm [shape: f32[32,256], index: 2, kind: output, shape index: {0}]   ;;  %s2482_s3 = inlined_call_operand.hbm [shape: f32[4,256], index: 3, kind: output, shape index: {1}]   ;;  %s2483_s4 = inlined_call_operand.hbm [shape: f32[4,256], index: 4, kind: output, shape index: {2}]  }
   0x1   :  { %12 = vsyncpa [#allocation3 + $0x1], 0 }
   0x2   :  { %13 = vsyncpa [#allocation5], 0 }
   0x3   :  { %15 = vsyncpa [#allocation5 + $0x1], 0  ;;  %s2070_s15 = smov 0   ;;  %s2072_s16 = smov 0  }
   0x4   :  { %s2074_s17 = smov 0   ;;  %s2076_s18 = smov 0  }
   0x5 LB: > { %s2091_s19 = sadd.s32 4294967295, %s2028_s18   ;;  %s1460_s20 = sadd.s32 4294967294, %s2028_s18   ;;  %s2028_s18 = sphi %s2076_s18, %s2491_s18   ;;  %s2024_s17 = sphi %s2074_s17, %s2490_s17   ;;  %s2020_s16 = sphi %s2072_s16, %s2489_s16   ;;  %s2016_s15 = sphi %s2070_s15, %s2488_s15  }
   0x6   : > { %s2095_s21 = sadd.s32 1, %s2028_s18   ;;  %s75_s22 = sadd.s32 1, %s2024_s17 }
   0x7   : > { %s72_s23 = ssub.s32 %s2028_s18, %s2095_s21  ;;  %p85_p0 = scmp.ne.s32.totalorder %s2024_s17, %s2020_s16 }
   0x8   : > { %p73_p1 = scmp.eq.s32.totalorder %s72_s23, 0  ;;  %p86_p2 = scmp.eq.s32.totalorder %s2091_s19, 1 }
   0x9   : > { %p91_p3 = scmp.ne.s32.totalorder %s2020_s16, %s2016_s15  ;;  %p92_p4 = scmp.eq.s32.totalorder %s1460_s20, 1 }
   0xa   : > { %s2108_s24 = scalar_select %p73_p1, %s2024_s17, %s75_s22  }
   0xb   : > { %p2110_p5 = por %p86_p2, %p85_p0  ;;  %p2114_p6 = por %p92_p4, %p91_p3 }
   0xc   : > { %p1463_p7 = scmp.ge.s32.totalorder %s2028_s18, 1  ;;  %p174_p8 = scmp.lt.s32.totalorder %s2028_s18, 3 }
   0xe   : > { %p175_p9 = pnand %p1463_p7, %p174_p8 }
   0xf   : > { %s1467_s27 = sshll.u32 (!%p175_p9), %s2091_s19, 4  ;;  %vm244_vm0 = vcmask (!%p175_p9), 261120   ;;  %v232_v0 = vld [vmem:[%s2480_s1] sm:$0xff] (!%p175_p9)  ;;  %v2030_v1 = vmov (!%p175_p9), 32   ;;  %v233_v2 = vld [vmem:[%s2480_s1 + $0x8] sm:$0xff] (!%p175_p9)  ;;  %v2031_v28 = vmov (!%p175_p9), 0.0|0.0  }
  0x10   : > { %178 = sbr.rel (%p175_p9) target bundleno = 1849 (0x739), region = 28  ;;  %p211_p10 = scmp.lt.s32.totalorder (!%p175_p9), %s1467_s27, 31  ;;  %1622 = vmatprep.mubr.msk.f32.mxu0 (!%p175_p9), %vm244_vm0, %v232_v0  ;;  %1869 = vset.pattern.permute.xlu0 (!%p175_p9), %v2030_v1  ;;  %vm2135_vm1 = vmpackc.low (!%p175_p9), %vm244_vm0, %vm244_vm0  ;;  %vm2032_vm2 = vmmov (!%p175_p9), 0   ;;  %v2033_v29 = vmov (!%p175_p9), 0.0   ;;  %v374_v30 = vld [vmem:[%s2480_s1 + $0x10] sm:$0xff] (!%p175_p9)  ;;  %v2034_v31 = vmov (!%p175_p9), 16  }
  0x11   : > { %236 = vperm.xlu0 (!%p175_p9), %1869, %v232_v0   ;;  %1637 = vmatprep.subr.mxu1 (!%p175_p9), %v2033_v29  ;;  %vm380_vm3 = vcmask (!%p175_p9), 130048   ;;  %v454_v41 = vld [vmem:[%s2480_s1 + $0x18] sm:$0x3] (!%p175_p9)  ;;  %v2035_v42 = vmov (!%p175_p9), 8   ;;  %v616_v43 = vld [vmem:[%s2480_s1 + $0x28] sm:$0xff] (!%p175_p9)  ;;  %v617_v44 = vld [vmem:[%s2480_s1 + $0x30] sm:$0xff] (!%p175_p9)  ;;  %v830_v0 = vlaneseq (!%p175_p9) }
  0x12   : > { %1639 = vmatprep.mubr.msk.f32.mxu1 (!%p175_p9), %vm2032_vm2, %v2033_v29  ;;  %1870 = vset.pattern.permute.xlu1 (!%p175_p9), %v2034_v31  ;;  %vm460_vm4 = vcmask (!%p175_p9), 64512   ;;  %v533_v50 = vld [vmem:[%s2480_s1 + $0x20] sm:$0xff] (!%p175_p9)  ;;  %v2036_v51 = vmov (!%p175_p9), 2   ;;  %vm542_vm5 = vcmask (!%p175_p9), 1041408   ;;  %vm539_vm6 = vcmask (!%p175_p9), 15360   ;;  %v709_v60 = vld [vmem:[%s2480_s1 + $0x38] sm:$0xff] (!%p175_p9) }
  0x13   : > { %377 = vperm.xlu1 (!%p175_p9), %1870, %v374_v30   ;;  %v710_v61 = vld [vmem:[%s2480_s1 + $0x40] sm:$0xff] (!%p175_p9)  ;;  %v711_v62 = vld [vmem:[%s2480_s1 + $0x48] sm:$0xff] (!%p175_p9)  ;;  %v712_v63 = vld [vmem:[%s2480_s1 + $0x50] sm:$0xff] (!%p175_p9)  ;;  %v831_v1 = vshrl.u32 (!%p175_p9), %v830_v0, 7  ;;  %s1528_s10 = sshll.u32 (!%p175_p9), %s2091_s19, 6  ;;  %s1527_s22 = sshll.u32 (!%p175_p9), %s2091_s19, 7 }
  0x14   : > { %s2374_s13 = scalar_lea.hbm (!%p175_p9), %s2482_s3, %s1528_s10  ;;  %s2039_s11 = smov (!%p175_p9), [#allocation4]  }
  0x15   : > { %241 = vperm.xlu0 (!%p175_p9), %1869, %v233_v2  }
  0x17   : > { %s2493_s27 = smov (!%p211_p10, %s1467_s27), 31  ;;  %1871 = vset.pattern.permute.xlu1 %v2035_v42 }
  0x18   : > { %s1468_s30 = sshll.u32 %s2493_s27, 3  ;;  %457 = vperm.xlu1 %1871, %v454_v41  }
  0x19   : > { %s2131_s9 = scalar_lea.vmem %s2479_s0, %s1468_s30  ;;  %1872 = vset.pattern.permute.xlu0 %v2036_v51  ;;  %s2250_s30 = sand.u32 1, %s2020_s16  }
  0x1a   : > { %v216_v4 = vld [vmem:[%s2131_s9] sm:$0xff]  ;;  %v217_v5 = vld [vmem:[%s2131_s9 + $0x8] sm:$0xff]  ;;  %v218_v6 = vld [vmem:[%s2131_s9 + $0x10] sm:$0xff]  ;;  %536 = vperm.xlu0 %1872, %v533_v50   ;;  %s1465_s5 = sshll.u32 %s2250_s30, 2  ;;  %s1464_s27 = sshll.u32 %s2250_s30, 5 }
  0x1b   : > { %v2142_v7 = vpack.c.bf16 %v217_v5, %v216_v4  ;;  %v219_v8 = vld [vmem:[%s2131_s9 + $0x18] sm:$0xff]  ;;  %v220_v10 = vld [vmem:[%s2131_s9 + $0x20] sm:$0xff]  ;;  %v221_v11 = vld [vmem:[%s2131_s9 + $0x28] sm:$0xff]  ;;  %s2255_s6 = scalar_lea.vmem [#allocation4], %s1465_s5  ;;  %v833_v4 = vadd.s32 16, %v831_v1  ;;  %v834_v5 = vadd.s32 24, %v831_v1 }
  0x1c   : > { %v2145_v9 = vpack.c.bf16 %v219_v8, %v218_v6  ;;  %v2158_v12 = vpack.c.bf16 %v221_v11, %v220_v10  ;;  %v222_v13 = vld [vmem:[%s2131_s9 + $0x30] sm:$0xff]  ;;  %v223_v14 = vld [vmem:[%s2131_s9 + $0x38] sm:$0xff]  ;;  %v224_v16 = vld [vmem:[%s2131_s9 + $0x40] sm:$0xff]  ;;  %620 = vperm.xlu1 %1871, %v616_v43   ;;  %v2037_v8 = vmov 3   ;;  %v2038_v10 = vmov 4   ;;  %s2347_s28 = scalar_lea.vmem [#allocation2], %s1464_s27 }
  0x1d   : > { %1707 = vmatprep.subr.msk.bf16.mxu0 %vm2135_vm1, %v2142_v7  ;;  %v2168_v15 = vpack.c.bf16 %v223_v14, %v222_v13  ;;  %v225_v17 = vld [vmem:[%s2131_s9 + $0x48] sm:$0xff]  ;;  %v226_v19 = vld [vmem:[%s2131_s9 + $0x50] sm:$0xff]  ;;  %v227_v20 = vld [vmem:[%s2131_s9 + $0x58] sm:$0xff]  ;;  %s1311_s8 = sshll.u32 %s2347_s28, 4  ;;  %s1327_s14 = sshll.u32 %s2255_s6, 4  ;;  %s2365_s8 = int_to_ptr.vmem [resolvable:$true] %s1311_s8  ;;  %s2378_s14 = int_to_ptr.vmem [resolvable:$true] %s1327_s14 }
  0x1e   : > { %1710 = vmatpush3.bf16.xpose.msk.msra.mxu0 %vm2135_vm1, %v2142_v7  ;;  %v2178_v18 = vpack.c.bf16 %v225_v17, %v224_v16  ;;  %v2188_v21 = vpack.c.bf16 %v227_v20, %v226_v19  ;;  %v228_v22 = vld [vmem:[%s2131_s9 + $0x60] sm:$0xff]  ;;  %v229_v23 = vld [vmem:[%s2131_s9 + $0x68] sm:$0xff]  ;;  %v230_v25 = vld [vmem:[%s2131_s9 + $0x70] sm:$0xff]  ;;  %1873 = vset.pattern.permute.xlu0 %v2034_v31  ;;  %s1906_s7 = scalar_lea.vmem %s2378_s14, 64 }
  0x1f   : > { %1713 = vmatprep.subr.msk.bf16.mxu0 %vm2135_vm1, %v2145_v9  ;;  %v2198_v24 = vpack.c.bf16 %v229_v23, %v228_v22  ;;  %v231_v26 = vld [vmem:[%s2131_s9 + $0x78] sm:$0xff]  ;;  %715 = vperm.xlu0 %1873, %v709_v60   ;;  %s1293_s9 = sand.u32 1, %s2091_s19   ;;  %p1907_p11 = scmp.ne.s32.totalorder %s2378_s14, %s1906_s7 }
  0x20   : > { %v2208_v27 = vpack.c.bf16 %v231_v26, %v230_v25  ;;  %625 = vperm.xlu1 %1871, %v617_v44   ;;  %v1098_v6 = vld [vmem:[%s2480_s1 + $0x58] sm:$0xff]  ;;  %s2385_s29 = scalar_lea.sflag [#allocation5], %s1293_s9 }
  0x21   : > { %p1908_p12 = pnand %p1907_p11, %p2110_p5 }
  0x23   : > { %730 = vperm.xlu0 %1873, %v712_v63   ;;  %p1909_p13 = pneg %p1908_p12 }
  0x24   : > { %1874 = vset.pattern.permute.xlu1 %v2034_v31 }
  0x25   : > { %720 = vperm.xlu1 %1874, %v710_v61  }
  0x26   : > { %1716 = vmatpush3.bf16.xpose.msk.msra.mxu0 %vm2135_vm1, %v2145_v9 }
  0x27   : > { %1719 = vmatprep.subr.msk.bf16.mxu0 %vm2135_vm1, %v2158_v12  ;;  %1876 = vset.pattern.permute.xlu0 %v2037_v8 }
  0x28   : > { %1178 = vperm.xlu0 %1876, %v1098_v6  }
  0x29   : > { %725 = vperm.xlu1 %1874, %v711_v62  }
  0x2c   : > { %1879 = vset.pattern.permute.xlu0 %v2035_v42 }
  0x2d   : > { %1875 = vset.pattern.permute.xlu1 %v2036_v51 }
  0x2e   : > { %1722 = vmatpush3.bf16.xpose.msk.msra.mxu0 %vm2135_vm1, %v2158_v12  ;;  %1101 = vperm.xlu1 %1875, %v1098_v6  }
  0x2f   : > { %1725 = vmatprep.subr.msk.bf16.mxu0 %vm2135_vm1, %v2168_v15 }
  0x32   : > { %1877 = vset.pattern.permute.xlu1 %v2038_v10 }
  0x33   : > { %1184 = vperm.xlu1 %1877, %v1098_v6  }
  0x36   : > { %1728 = vmatpush3.bf16.xpose.msk.msra.mxu0 %vm2135_vm1, %v2168_v15 }
  0x37   : > { %1731 = vmatprep.subr.msk.bf16.mxu0 %vm2135_vm1, %v2178_v18  ;;  %1878 = vset.pattern.permute.xlu1 %v2035_v42 }
  0x3e   : > { %1734 = vmatpush3.bf16.xpose.msk.msra.mxu0 %vm2135_vm1, %v2178_v18 }
  0x3f   : > { %1737 = vmatprep.subr.msk.bf16.mxu0 %vm2135_vm1, %v2188_v21 }
  0x46   : > { %1740 = vmatpush3.bf16.xpose.msk.msra.mxu0 %vm2135_vm1, %v2188_v21 }
  0x47   : > { %1743 = vmatprep.subr.msk.bf16.mxu0 %vm2135_vm1, %v2198_v24 }
  0x4e   : > { %1746 = vmatpush3.bf16.xpose.msk.msra.mxu0 %vm2135_vm1, %v2198_v24 }
  0x4f   : > { %1749 = vmatprep.subr.msk.bf16.mxu0 %vm2135_vm1, %v2208_v27 }
  0x56   : > { %1752 = vmatpush3.bf16.xpose.msk.msra.mxu0 %vm2135_vm1, %v2208_v27 }
  0x57   : > { %1753 = vmatprep.subr.bf16.mxu0 %v2031_v28 }
  0x5d   : > { %1623 = vmatmul.mubr.msk.f32.vlgmr.msra.gmra.mrb[0].mxu0 %vm244_vm0, %v233_v2  ;;  %v836_v2 = vand.u32 127, %v830_v0 }
  0x5e   : > { %1629 = vmatprep.mubr.msk.f32.mxu0 %vm2032_vm2, %v2033_v29 }
  0x5f   : > { %vm839_vm7 = vcmp.eq.s32.totalorder %v833_v4, %v836_v2  ;;  %vm840_vm8 = vcmp.eq.s32.totalorder %v834_v5, %v836_v2  ;;  %vm837_vm9 = vcmp.eq.s32.totalorder %v831_v1, %v836_v2 }
  0x60   : > { %v1497_v25 = vsel %vm837_vm9, 1.0, %v2033_v29 }
  0x90   : > { %v237_v32 = vpop.permute.xlu0 %236 }
  0x92   : > { %v378_v45 = vpop.permute.xlu1 %377 }
  0x94   : > { %v242_v33 = vpop.permute.xlu0 %241 }
  0x97   : > { %v458_v52 = vpop.permute.xlu1 %457 }
  0x99   : > { %v537_v56 = vpop.permute.xlu0 %536 }
  0x9b   : > { %v621_v11 = vpop.permute.xlu1 %620 }
  0x9f   : > { %v626_v13 = vpop.permute.xlu1 %625 }
 0x130   : > { %v1624_v34 = vpop.f32.mrb[0].mxu0 }
 0x131   : > { %v369_v35 = vadd.f32 %v1624_v34, %v242_v33  ;;  %v363_v36 = vpop.f32.mrb[1].mxu0 }
 0x132   : > { %v364_v37 = vadd.f32 %v363_v36, %v237_v32  ;;  %v2356_v36 = vld [vmem:[%s2480_s1 + $0x60] sm:$0xf] }
 0x133   : > { %1880 = vtanh.f32 %v369_v35  ;;  %1192 = vperm.xlu1 %1878, %v2356_v36  }
 0x134   : > { %1882 = vtanh.f32 %v364_v37 }
 0x13d   : > { %v1881_v38 = vpop.eup %1880 }
 0x13e   : > { %v1883_v39 = vpop.eup %1882 }
 0x13f   : > { %v1754_v40 = vpack.c.bf16 %v1881_v38, %v1883_v39 }
 0x141   : > { %1755 = vmatpush3.bf16.msra.mxu0 %v1754_v40 }
 0x142   : > { %1632 = vmatprep.subr.mxu0 %v2033_v29 }
 0x144   : > { %1630 = vmatmul.mubr.msk.f32.vlgmr.msra.gmra.mrb[2].mxu0 %vm380_vm3, %v374_v30 }
 0x145   : > { %1634 = vmatprep.mubr.msk.f32.mxu0 %vm2032_vm2, %v2033_v29 }
 0x217   : > { %v449_v46 = vpop.f32.mrb[2].mxu0 }
 0x218   : > { %v450_v47 = vadd.f32 %v449_v46, %v378_v45  ;;  %v1631_v48 = vpop.f32.mrb[3].mxu0 }
 0x21a   : > { %1884 = vtanh.f32 %v450_v47 }
 0x224   : > { %v1885_v49 = vpop.eup %1884 }
 0x225   : > { %1633 = vmatpush3.msra.mxu0 %v1885_v49 }
 0x226   : > { %1635 = vmatmul.mubr.msk.f32.vlgmr.msra.gmra.mrb[4].mxu0 %vm460_vm4, %v454_v41  ;;  %1695 = vmatprep.subr.mxu0 %v2033_v29 }
 0x227   : > { %1697 = vmatprep.mubr.msk.f32.mxu0 %vm2032_vm2, %v2033_v29 }
 0x2f9   : > { %v529_v53 = vpop.f32.mrb[4].mxu0 }
 0x2fa   : > { %v530_v54 = vadd.f32 %v529_v53, %v458_v52  ;;  %v1636_v55 = vpop.f32.mrb[5].mxu0 }
 0x2fc   : > { %1095 = vst [vmem:[%s2255_s6] sm:$0x3] %v530_v54  ;;  %1638 = vmatpush3.msk.msra.mxu1 %vm542_vm5, %v530_v54  ;;  %1696 = vmatpush3.msk.msra.mxu0 %vm542_vm5, %v530_v54 }
 0x2fd   : > { %1640 = vmatmul.mubr.msk.f32.vlgmr.msra.gmra.mrb[0].mxu1 %vm539_vm6, %v533_v50  ;;  %1700 = vmatprep.subr.mxu0 %v2033_v29 }
 0x2fe   : > { %1644 = vmatprep.mubr.msk.f32.mxu1 %vm460_vm4, %v616_v43  ;;  %1698 = vmatmul.mubr.msk.f32.vlgmr.msra.gmra.mrb[6].mxu0 %vm539_vm6, %v1098_v6 }
 0x2ff   : > { %1702 = vmatprep.mubr.msk.f32.mxu0 %vm2032_vm2, %v2033_v29 }
 0x3d0   : > { %v612_v57 = vpop.f32.mrb[0].mxu1 }
 0x3d1   : > { %v613_v58 = vadd.f32 %v612_v57, %v537_v56  ;;  %v1641_v59 = vpop.f32.mrb[1].mxu1 }
 0x3d3   : > { %1642 = vmatprep.subr.mxu1 %v613_v58 }
 0x3d4   : > { %1643 = vmatpush3.msra.mxu1 %v613_v58 }
 0x3d5   : > { %1645 = vmatmul.mubr.msk.f32.vlgmr.msra.gmra.mrb[2].mxu1 %vm460_vm4, %v617_v44 }
 0x3d6   : > { %1651 = vmatprep.mubr.msk.f32.mxu1 %vm380_vm3, %v709_v60 }
 0x4a8   : > { %v1646_v14 = vpop.f32.mrb[2].mxu1 }
 0x4a9   : > { %v704_v16 = vadd.f32 %v1646_v14, %v626_v13  ;;  %v698_v17 = vpop.f32.mrb[3].mxu1 }
 0x4aa   : > { %v699_v19 = vadd.f32 %v698_v17, %v621_v11 }
 0x4ab   : > { %1886 = vtanh.f32 %v704_v16 }
 0x4ac   : > { %1888 = vtanh.f32 %v699_v19 }
 0x4b5   : > { %v1887_v20 = vpop.eup %1886 }
 0x4b6   : > { %v1889_v22 = vpop.eup %1888 }
 0x4b7   : > { %v1756_v23 = vpack.c.bf16 %v1887_v20, %v1889_v22 }
 0x4b9   : > { %1757 = vmatprep.subr.bf16.mxu1 %v1756_v23 }
 0x4ba   : > { %1759 = vmatpush3.bf16.msra.mxu1 %v1756_v23 }
 0x4bb   : > { %1762 = vmatprep.subr.msk.bf16.mxu1 %vm2135_vm1, %v2142_v7 }
 0x4bd   : > { %1652 = vmatmul.mubr.msk.f32.vlgmr.msra.gmra.mrb[4].mxu1 %vm380_vm3, %v710_v61 }
 0x4be   : > { %1654 = vmatprep.mubr.msk.f32.mxu1 %vm380_vm3, %v711_v62 }
 0x4c1   : > { %1655 = vmatmul.mubr.msk.f32.gmra.mrb[6].mxu1 %vm380_vm3, %v712_v63 }
 0x4c2   : > { %1689 = vmatprep.mubr.msk.f32.mxu1 %vm244_vm0, %v1497_v25 }
 0x4c3   : > { %1765 = vmatpush3.bf16.xpose.msk.msra.mxu1 %vm2135_vm1, %v2142_v7  ;;  %v832_v7 = vadd.s32 8, %v831_v1 }
 0x4c4   : > { %1768 = vmatprep.subr.msk.bf16.mxu1 %vm2135_vm1, %v2145_v9 }
 0x4c5   : > { %vm838_vm10 = vcmp.eq.s32.totalorder %v832_v7, %v836_v2 }
 0x4cb   : > { %1771 = vmatpush3.bf16.xpose.msk.msra.mxu1 %vm2135_vm1, %v2145_v9  ;;  %v1498_v9 = vsel %vm838_vm10, 1.0, %v2033_v29 }
 0x4cc   : > { %1774 = vmatprep.subr.msk.bf16.mxu1 %vm2135_vm1, %v2158_v12 }
 0x4d3   : > { %1777 = vmatpush3.bf16.xpose.msk.msra.mxu1 %vm2135_vm1, %v2158_v12  ;;  %v1499_v12 = vsel %vm839_vm7, 1.0, %v2033_v29 }
 0x4d4   : > { %1780 = vmatprep.subr.msk.bf16.mxu1 %vm2135_vm1, %v2168_v15 }
 0x4db   : > { %1783 = vmatpush3.bf16.xpose.msk.msra.mxu1 %vm2135_vm1, %v2168_v15  ;;  %v1500_v15 = vsel %vm840_vm8, 1.0, %v2033_v29 }
 0x4dc   : > { %1786 = vmatprep.subr.msk.bf16.mxu1 %vm2135_vm1, %v2178_v18 }
 0x4e3   : > { %1789 = vmatpush3.bf16.xpose.msk.msra.mxu1 %vm2135_vm1, %v2178_v18  ;;  %v2344_v18 = vpop.f32.mrb[6].mxu0 }
 0x4e4   : > { %1792 = vmatprep.subr.msk.bf16.mxu1 %vm2135_vm1, %v2188_v21  ;;  %v1699_v3 = vpop.f32.mrb[7].mxu0 }
 0x4eb   : > { %1795 = vmatpush3.bf16.xpose.msk.msra.mxu1 %vm2135_vm1, %v2188_v21  ;;  %v716_v21 = vpop.permute.xlu0 %715 }
 0x4ec   : > { %1798 = vmatprep.subr.msk.bf16.mxu1 %vm2135_vm1, %v2198_v24 }
 0x4ef   : > { %v731_v31 = vpop.permute.xlu0 %730 }
 0x4f3   : > { %1801 = vmatpush3.bf16.xpose.msk.msra.mxu1 %vm2135_vm1, %v2198_v24  ;;  %v721_v24 = vpop.permute.xlu1 %720 }
 0x4f4   : > { %1804 = vmatprep.subr.msk.bf16.mxu1 %vm2135_vm1, %v2208_v27 }
 0x4f7   : > { %v726_v29 = vpop.permute.xlu1 %725 }
 0x4fb   : > { %1807 = vmatpush3.bf16.xpose.msk.msra.mxu1 %vm2135_vm1, %v2208_v27 }
 0x502   : > { %1690 = vmatmul.mubr.msk.f32.vlgmr.msra.gmra.mrb[8].mxu1 %vm244_vm0, %v1498_v9 }
 0x503   : > { %1692 = vmatprep.mubr.msk.f32.mxu1 %vm244_vm0, %v1499_v12 }
 0x506   : > { %1693 = vmatmul.mubr.msk.f32.gmra.mrb[10].mxu1 %vm244_vm0, %v1500_v15 }
 0x590   : > { %v1653_v26 = vpop.f32.mrb[4].mxu1 }
 0x591   : > { %v813_v27 = vadd.f32 %v1653_v26, %v721_v24  ;;  %v807_v28 = vpop.f32.mrb[5].mxu1 }
 0x592   : > { %v808_v30 = vadd.f32 %v807_v28, %v716_v21 }
 0x593   : > { %827 = vst [vmem:[%s2347_s28 + $0x8] sm:$0xff] %v813_v27  ;;  %v1055_v37 = vmul.f32 %v813_v27, %v813_v27 }
 0x594   : > { %826 = vst [vmem:[%s2347_s28] sm:$0xff] %v808_v30  ;;  %v1656_v32 = vpop.f32.mrb[6].mxu1  ;;  %v1054_v38 = vmul.f32 %v808_v30, %v808_v30 }
 0x595   : > { %v817_v33 = vpop.f32.mrb[7].mxu1  ;;  %v823_v34 = vadd.f32 %v1656_v32, %v731_v31 }
 0x596   : > { %v818_v35 = vadd.f32 %v817_v33, %v726_v29  ;;  %v1058_v39 = vadd.f32 %v1055_v37, %v1054_v38 }
 0x597   : > { %829 = vst [vmem:[%s2347_s28 + $0x18] sm:$0xff] %v823_v34  ;;  %v1057_v42 = vmul.f32 %v823_v34, %v823_v34 }
 0x598   : > { %828 = vst [vmem:[%s2347_s28 + $0x10] sm:$0xff] %v818_v35  ;;  %v1056_v40 = vmul.f32 %v818_v35, %v818_v35  ;;  %s2383_s28 = scalar_lea.hbm %s2481_s2, %s1527_s22 }
 0x59a   : > { %v1059_v41 = vadd.f32 %v1058_v39, %v1056_v40 }
 0x59c   : > { %v1060_v43 = vadd.f32 %v1059_v41, %v1057_v42 }
 0x59e   : > { %v1061_v44 = vrot.slane %v1060_v43, 4 }
 0x5a0   : > { %v1062_v45 = vadd.f32 %v1061_v44, %v1060_v43 }
 0x5a2   : > { %v1063_v46 = vrot.slane %v1062_v45, 2 }
 0x5a4   : > { %v1064_v55 = vadd.f32 %v1063_v46, %v1062_v45 }
 0x5a6   : > { %v1065_v4 = vrot.slane %v1064_v55, 1 }
 0x5a8   : > { %v1066_v19 = vadd.f32 %v1065_v4, %v1064_v55 }
 0x5aa   : > { %1890 = vrsqrt.f32 %v1066_v19  ;;  %vm1069_vm11 = vcmp.eq.f32.partialorder %v1066_v19, inf  ;;  %v1072_v33 = vand.u32 2147483648, %v1066_v19  ;;  %vm1071_vm12 = vcmp.eq.f32.partialorder %v1066_v19, 0.0 }
 0x5d5   : > { %v1691_v47 = vpop.f32.mrb[8].mxu1 }
 0x5d6   : > { %v1011_v48 = vsub.f32 %v1691_v47, %v813_v27  ;;  %v1035_v49 = vmul.f32 %v1691_v47, %v1691_v47  ;;  %v1075_v50 = vmul.f32 %v1691_v47, %v813_v27  ;;  %v991_v51 = vpop.f32.mrb[9].mxu1  ;;  %v1891_v27 = vpop.eup %1890 }
 0x5d7   : > { %v1010_v52 = vsub.f32 %v991_v51, %v808_v30  ;;  %v1034_v53 = vmul.f32 %v991_v51, %v991_v51  ;;  %v1074_v54 = vmul.f32 %v991_v51, %v808_v30  ;;  %v1068_v30 = vmul.f32 %v1891_v27, %v1066_v19 }
 0x5d8   : > { %v1015_v56 = vmul.f32 %v1011_v48, %v1011_v48 }
 0x5d9   : > { %v1014_v57 = vmul.f32 %v1010_v52, %v1010_v52  ;;  %v1038_v58 = vadd.f32 %v1035_v49, %v1034_v53  ;;  %v1078_v59 = vadd.f32 %v1075_v50, %v1074_v54  ;;  %v1694_v60 = vpop.f32.mrb[10].mxu1  ;;  %v1070_v29 = vsel %vm1069_vm11, %v1066_v19, %v1068_v30  ;;  %v1102_v53 = vpop.permute.xlu1 %1101 }
 0x5da   : > { %v1013_v61 = vsub.f32 %v1694_v60, %v823_v34  ;;  %v1001_v62 = vpop.f32.mrb[11].mxu1  ;;  %v1037_v5 = vmul.f32 %v1694_v60, %v1694_v60  ;;  %v1077_v6 = vmul.f32 %v1694_v60, %v823_v34  ;;  %v1073_v38 = vsel %vm1071_vm12, %v1072_v33, %v1070_v29 }
 0x5db   : > { %v1018_v63 = vadd.f32 %v1015_v56, %v1014_v57  ;;  %v1012_v0 = vsub.f32 %v1001_v62, %v818_v35  ;;  %v1036_v1 = vmul.f32 %v1001_v62, %v1001_v62  ;;  %v1076_v2 = vmul.f32 %v1001_v62, %v818_v35 }
 0x5dc   : > { %v1017_v13 = vmul.f32 %v1013_v61, %v1013_v61  ;;  %v1091_v43 = vmax.f32 %v1073_v38, 1e-08 }
 0x5dd   : > { %v1016_v8 = vmul.f32 %v1012_v0, %v1012_v0  ;;  %v1039_v10 = vadd.f32 %v1038_v58, %v1036_v1  ;;  %v1079_v11 = vadd.f32 %v1078_v59, %v1076_v2  ;;  %v1179_v58 = vpop.permute.xlu0 %1178 }
 0x5df   : > { %v1019_v14 = vadd.f32 %v1018_v63, %v1016_v8  ;;  %v1040_v16 = vadd.f32 %v1039_v10, %v1037_v5  ;;  %v1080_v17 = vadd.f32 %v1079_v11, %v1077_v6  ;;  %v1185_v63 = vpop.permute.xlu1 %1184 }
 0x5e1   : > { %v1020_v20 = vadd.f32 %v1019_v14, %v1017_v13  ;;  %v1041_v22 = vrot.slane %v1040_v16, 4  ;;  %v1081_v31 = vrot.slane %v1080_v17, 4 }
 0x5e3   : > { %v1021_v23 = vrot.slane %v1020_v20, 4  ;;  %v1042_v25 = vadd.f32 %v1041_v22, %v1040_v16  ;;  %v1082_v35 = vadd.f32 %v1081_v31, %v1080_v17 }
 0x5e5   : > { %v1022_v7 = vadd.f32 %v1021_v23, %v1020_v20  ;;  %v1043_v9 = vrot.slane %v1042_v25, 2  ;;  %v1083_v44 = vrot.slane %v1082_v35, 2 }
 0x5e7   : > { %v1023_v12 = vrot.slane %v1022_v7, 2  ;;  %v1044_v15 = vadd.f32 %v1043_v9, %v1042_v25  ;;  %v1084_v48 = vadd.f32 %v1083_v44, %v1082_v35 }
 0x5e9   : > { %v1024_v21 = vadd.f32 %v1023_v12, %v1022_v7  ;;  %v1045_v3 = vrot.slane %v1044_v15, 1  ;;  %v1085_v50 = vrot.slane %v1084_v48, 1 }
 0x5eb   : > { %v1046_v24 = vadd.f32 %v1045_v3, %v1044_v15  ;;  %v1025_v26 = vrot.slane %v1024_v21, 1  ;;  %v1086_v56 = vadd.f32 %v1085_v50, %v1084_v48 }
 0x5ed   : > { %1892 = vrsqrt.f32 %v1046_v24  ;;  %v1026_v28 = vadd.f32 %v1025_v26, %v1024_v21  ;;  %vm1049_vm13 = vcmp.eq.f32.partialorder %v1046_v24, inf  ;;  %v1052_v37 = vand.u32 2147483648, %v1046_v24 }
 0x5ee   : > { %vm1051_vm14 = vcmp.eq.f32.partialorder %v1046_v24, 0.0 }
 0x5ef   : > { %1894 = vrsqrt.f32 %v1026_v28  ;;  %vm1029_vm15 = vcmp.eq.f32.partialorder %v1026_v28, inf  ;;  %v1032_v51 = vand.u32 2147483648, %v1026_v28  ;;  %vm1031_vm0 = vcmp.eq.f32.partialorder %v1026_v28, 0.0 }
 0x5f7   : > { %v1893_v32 = vpop.eup %1892 }
 0x5f8   : > { %v1048_v34 = vmul.f32 %v1893_v32, %v1046_v24 }
 0x5f9   : > { %v1895_v45 = vpop.eup %1894 }
 0x5fa   : > { %v1050_v39 = vsel %vm1049_vm13, %v1046_v24, %v1048_v34  ;;  %v1028_v47 = vmul.f32 %v1895_v45, %v1026_v28 }
 0x5fb   : > { %v1053_v40 = vsel %vm1051_vm14, %v1052_v37, %v1050_v39 }
 0x5fc   : > { %v1087_v41 = vmax.f32 %v1053_v40, 1.1920929e-07  ;;  %v1090_v42 = vmax.f32 %v1053_v40, 1e-08  ;;  %v1030_v49 = vsel %vm1029_vm15, %v1026_v28, %v1028_v47 }
 0x5fd   : > { %v1033_v54 = vsel %vm1031_vm0, %v1032_v51, %v1030_v49 }
 0x5fe   : > { %1896 = vrcp.f32 %v1087_v41  ;;  %v1092_v46 = vmul.f32 %v1091_v43, %v1090_v42 }
 0x600   : > { %1898 = vrcp.f32 %v1092_v46 }
 0x608   : > { %v1897_v52 = vpop.eup %1896 }
 0x609   : > { %v1089_v55 = vmul.f32 %v1897_v52, %v1033_v54 }
 0x60a   : > { %v1899_v57 = vpop.eup %1898 }
 0x60b   : > { %1096 = vst [vmem:[%s2255_s6 + $0x2] sm:$0x1] %v1089_v55  ;;  %v1104_v59 = vmul.f32 %v1102_v53, %v1089_v55  ;;  %v1094_v60 = vmul.f32 %v1899_v57, %v1086_v56 }
 0x60d   : > { %v1174_v61 = vadd.f32 %v2344_v18, %v1104_v59  ;;  %1097 = vst [vmem:[%s2255_s6 + $0x3] sm:$0x1] %v1094_v60  ;;  %v1181_v62 = vmul.f32 %v1179_v58, %v1094_v60  ;;  %s1910_s6 = sshll.u32 %s2039_s11, 4  ;;  %s1911_s6 = int_to_ptr.vmem [resolvable:$false] %s1910_s6 }
 0x60e   : > { %s1912_s12 = scalar_lea.vmem %s1911_s6, 128  ;;  %p1913_p0 = scmp.lt.s32.totalorder %s2378_s14, %s1911_s6 }
 0x60f   : > { %v1182_v0 = vadd.f32 %v1181_v62, %v1174_v61  ;;  %p1914_p1 = scmp.lt.s32.totalorder %s1912_s12, %s1906_s7 }
 0x611   : > { %v1187_v1 = vadd.f32 %v1185_v63, %v1182_v0  ;;  %p1915_p2 = por %p1914_p1, %p1913_p0 }
 0x613   : > { %1900 = vtanh.f32 %v1187_v1  ;;  %p1916_p3 = pnand %p1915_p2, %p1909_p13 }
 0x61d   : > { %v1901_v2 = vpop.eup %1900 }
 0x61e   : > { %1701 = vmatpush3.msra.mxu0 %v1901_v2 }
 0x61f   : > { %1703 = vmatmul.mubr.msk.f32.vlgmr.msra.gmra.mrb[8].mxu0 %vm460_vm4, %v2356_v36 }
 0x620   : > { %1919 = shalt.err (!%p1916_p3)
}
 0x621   : > { %s1920_s9 = scalar_lea.hbm %s2374_s13, 64  ;;  %s1924_s27 = scalar_lea.hbm %s2482_s3, 128 }
 0x622   : > { %p1921_p4 = scmp.ne.s32.totalorder %s2374_s13, %s1920_s9  ;;  %p1925_p9 = scmp.lt.u32.totalorder %s2374_s13, %s2482_s3 }
 0x623   : > { %p1926_p10 = scmp.lt.u32.totalorder %s1924_s27, %s1920_s9  ;;  %p1928_p12 = scmp.lt.u32.totalorder %s1920_s9, %s2374_s13 }
 0x624   : > { %p1922_p7 = pnand %p1921_p4, %p2110_p5 }
 0x625   : > { %p1927_p11 = por %p1926_p10, %p1925_p9 }
 0x626   : > { %p1923_p8 = pneg %p1922_p7 }
 0x627   : > { %p1929_p13 = por %p1928_p12, %p1927_p11 }
 0x629   : > { %p1930_p0 = pnand %p1929_p13, %p1923_p8 }
 0x62b   : > { %1933 = shalt.err (!%p1930_p0)
}
 0x62c   : > { %1809 = dma.vmem_to_hbm [thread:$0]  (%p2110_p5), %s2378_s14, 64, %s2374_s13, %s2385_s29  }
 0x62d   : > { %s1289_s7 = scalar_lea.sflag [#allocation3], %s2250_s30  ;;  %s1934_s12 = scalar_lea.vmem %s2365_s8, 512 }
 0x62e   : > { %p1935_p1 = scmp.ne.s32.totalorder %s2365_s8, %s1934_s12  ;;  %s2040_s9 = smov [#allocation2]  }
 0x62f   : > { %s1938_s22 = sshll.u32 %s2040_s9, 4  ;;  %s1939_s22 = int_to_ptr.vmem [resolvable:$false] %s1938_s22 }
 0x630   : > { %p1936_p2 = pnand %p1935_p1, %p2110_p5  ;;  %s1940_s23 = scalar_lea.vmem %s1939_s22, 1024 }
 0x631   : > { %p1941_p4 = scmp.lt.s32.totalorder %s2365_s8, %s1939_s22  ;;  %p1942_p7 = scmp.lt.s32.totalorder %s1940_s23, %s1934_s12 }
 0x632   : > { %p1937_p3 = pneg %p1936_p2 }
 0x633   : > { %p1943_p8 = por %p1942_p7, %p1941_p4 }
 0x635   : > { %p1944_p9 = pnand %p1943_p8, %p1937_p3 }
 0x637   : > { %1947 = shalt.err (!%p1944_p9)
}
 0x638   : > { %s1948_s13 = scalar_lea.hbm %s2383_s28, 512  ;;  %s1952_s11 = scalar_lea.hbm %s2481_s2, 1024 }
 0x639   : > { %p1949_p10 = scmp.ne.s32.totalorder %s2383_s28, %s1948_s13  ;;  %p1953_p13 = scmp.lt.u32.totalorder %s2383_s28, %s2481_s2 }
 0x63a   : > { %p1954_p0 = scmp.lt.u32.totalorder %s1952_s11, %s1948_s13  ;;  %p1956_p2 = scmp.lt.u32.totalorder %s1948_s13, %s2383_s28 }
 0x63b   : > { %p1950_p11 = pnand %p1949_p10, %p2110_p5 }
 0x63c   : > { %p1955_p1 = por %p1954_p0, %p1953_p13 }
 0x63d   : > { %p1951_p12 = pneg %p1950_p11 }
 0x63e   : > { %p1957_p3 = por %p1956_p2, %p1955_p1 }
 0x640   : > { %p1958_p4 = pnand %p1957_p3, %p1951_p12 }
 0x642   : > { %1961 = shalt.err (!%p1958_p4)
}
 0x643   : > { %s2041_s12 = smov 128   ;;  %s2042_s22 = smov 256   ;;  %v1193_v18 = vpop.permute.xlu1 %1192  ;;  %vm1267_vm1 = vcmask 1043456  }
 0x644   : > { %s2043_s23 = smov 8   ;;  %s2440_s14 = scalar_lea.hbm %s2483_s4, %s1528_s10 }
 0x645   : > { %1808 = dma.vmem_to_hbm [thread:$0]  (%p2110_p5), %s2365_s8, 512, %s2383_s28, %s1289_s7, %s2041_s12, %s2042_s22, %s2043_s23  }
 0x646   : > { %s209_s8 = scalar_lea.vmem [#allocation6], %s1465_s5  ;;  %s2044_s11 = smov [#allocation6]  }
 0x647   : > { %s1340_s28 = sshll.u32 %s209_s8, 4  ;;  %s1966_s6 = sshll.u32 %s2044_s11, 4  ;;  %s1341_s28 = int_to_ptr.vmem [resolvable:$true] %s1340_s28  ;;  %s1967_s6 = int_to_ptr.vmem [resolvable:$false] %s1966_s6 }
 0x648   : > { %s1962_s27 = scalar_lea.vmem %s1341_s28, 64  ;;  %s1968_s30 = scalar_lea.vmem %s1967_s6, 128 }
 0x649   : > { %p1963_p7 = scmp.ne.s32.totalorder %s1341_s28, %s1962_s27  ;;  %p1969_p10 = scmp.lt.s32.totalorder %s1341_s28, %s1967_s6 }
 0x64a   : > { %p1970_p11 = scmp.lt.s32.totalorder %s1968_s30, %s1962_s27 }
 0x64b   : > { %p1964_p8 = pnand %p1963_p7, %p2110_p5 }
 0x64c   : > { %p1971_p12 = por %p1970_p11, %p1969_p10 }
 0x64d   : > { %p1965_p9 = pneg %p1964_p8 }
 0x64f   : > { %p1972_p13 = pnand %p1971_p12, %p1965_p9 }
 0x6f2   : > { %v1263_v36 = vpop.f32.mrb[8].mxu0 }
 0x6f3   : > { %v1264_v4 = vadd.f32 %v1263_v36, %v1193_v18  ;;  %v1704_v5 = vpop.f32.mrb[9].mxu0 }
 0x6f5   : > { %v1268_v6 = vsel %vm1267_vm1, %v1264_v4, -inf }
 0x6f6   : > { %v1269_v8 = vrot.slane %v1268_v6, 4 }
 0x6f8   : > { %v1270_v10 = vmax.f32 %v1268_v6, %v1269_v8 }
 0x6fa   : > { %v1271_v11 = vrot.slane %v1270_v10, 2 }
 0x6fc   : > { %v1272_v13 = vmax.f32 %v1270_v10, %v1271_v11 }
 0x6fe   : > { %v1273_v14 = vrot.slane %v1272_v13, 1 }
 0x700   : > { %v1274_v16 = vmax.f32 %v1272_v13, %v1273_v14 }
 0x702   : > { %v1275_v17 = vsub.f32 %v1264_v4, %v1274_v16 }
 0x704   : > { %v1276_v19 = vmul.f32 1.442695, %v1275_v17 }
 0x706   : > { %1902 = vpow2.f32 %v1276_v19 }
 0x710   : > { %v1903_v20 = vpop.eup %1902 }
 0x711   : > { %v1278_v22 = vsel %vm1267_vm1, %v1903_v20, 0.0 }
 0x712   : > { %v1279_v23 = vrot.slane %v1278_v22, 4 }
 0x714   : > { %v1280_v25 = vadd.f32 %v1279_v23, %v1278_v22 }
 0x716   : > { %v1281_v7 = vrot.slane %v1280_v25, 2 }
 0x718   : > { %v1282_v9 = vadd.f32 %v1281_v7, %v1280_v25 }
 0x71a   : > { %v1283_v12 = vrot.slane %v1282_v9, 1 }
 0x71c   : > { %v1284_v15 = vadd.f32 %v1283_v12, %v1282_v9 }
 0x71e   : > { %1904 = vrcp.f32 %v1284_v15 }
 0x728   : > { %v1905_v21 = vpop.eup %1904 }
 0x729   : > { %v1286_v3 = vmul.f32 %v1905_v21, %v1903_v20 }
 0x72b   : > { %1287 = vst [vmem:[%s209_s8] sm:$0xf] %v1286_v3 }
 0x72c   : > { %1975 = shalt.err (!%p1972_p13)
}
 0x72d   : > { %s1976_s19 = scalar_lea.hbm %s2440_s14, 64  ;;  %s1980_s9 = scalar_lea.hbm %s2483_s4, 128 }
 0x72e   : > { %p1977_p0 = scmp.ne.s32.totalorder %s2440_s14, %s1976_s19  ;;  %p1981_p3 = scmp.lt.u32.totalorder %s2440_s14, %s2483_s4 }
 0x72f   : > { %p1982_p4 = scmp.lt.u32.totalorder %s1980_s9, %s1976_s19  ;;  %p1984_p8 = scmp.lt.u32.totalorder %s1976_s19, %s2440_s14 }
 0x730   : > { %p1978_p1 = pnand %p1977_p0, %p2110_p5 }
 0x731   : > { %p1983_p7 = por %p1982_p4, %p1981_p3 }
 0x732   : > { %p1979_p2 = pneg %p1978_p1 }
 0x733   : > { %p1985_p9 = por %p1984_p8, %p1983_p7 }
 0x735   : > { %p1986_p10 = pnand %p1985_p9, %p1979_p2 }
 0x737   : > { %1989 = shalt.err (!%p1986_p10)
}
 0x738   : > { %1810 = dma.vmem_to_hbm [thread:$0]  (%p2110_p5), %s1341_s28, 64, %s2440_s14, %s2385_s29  }
 0x739 PF: > { %p1824_p11 = scmp.ge.s32.totalorder %s2028_s18, 2  ;;  %s1352_s23 = sand.u32 1, %s2016_s15  }
 0x73a   : > { %s1353_s8 = scalar_lea.sflag [#allocation3], %s1352_s23 }
 0x73b   : > { %p1815_p12 = pnand %p1824_p11, %p2114_p6 }
 0x73d   : > { %2007 = dma.done.wait (!%p1815_p12), %s1353_s8, 512  }
 0x73e   : > { %2009 = vsyncadd (!%p1815_p12), %s1353_s8, 4294966784  ;;  %s1361_s7 = sand.u32 1, %s1460_s20  }
 0x73f   : > { %s1362_s13 = scalar_lea.sflag [#allocation5], %s1361_s7 }
 0x740   : > { %2011 = dma.done.wait (!%p1815_p12), %s1362_s13, 128  }
 0x741   : > { %2013 = vsyncadd (!%p1815_p12), %s1362_s13, 4294967168  ;;  %p18_p5 = scmp.ge.s32.totalorder %s2095_s21, 4   ;;  %s2488_s15 = smov %s2020_s16 }
 0x742   : > { %s2489_s16 = smov %s2024_s17  ;;  %s2490_s17 = smov %s2108_s24 }
 0x743   : > { %s2491_s18 = smov %s2095_s21  ;;  %20 = sbr.rel (!%p18_p5) target bundleno = 5 (0x5), region = 95 }
 0x74a   :  { %1376 = vsyncpa [#allocation3], 1 }
 0x74b   :  { %1378 = vsyncpa [#allocation3 + $0x1], 1 }
 0x74c   :  { %1379 = vsyncpa [#allocation5], 1 }
 0x74d   :  { %1381 = vsyncpa [#allocation5 + $0x1], 1 }

// kernel: tpu_custom_call.1
= control target key start
LH: loop header
LB: loop body
LE: loop exit
PB: predicated region body
PF: predicated region fallthrough
CT: control target
= control target key end

     0   :  { %10 = vsyncpa [#allocation3], 0  ;;  %s2479_s0 = inlined_call_operand.vmem [shape: f32[256,32], index: 0, kind: input, shape index: {}]   ;;  %s2480_s1 = inlined_call_operand.vmem [shape: f32[104,128], index: 1, kind: input, shape index: {}]   ;;  %s2481_s2 = inlined_call_operand.hbm [shape: f32[32,256], index: 2, kind: output, shape index: {0}]   ;;  %s2482_s3 = inlined_call_operand.hbm [shape: f32[4,256], index: 3, kind: output, shape index: {1}]   ;;  %s2483_s4 = inlined_call_operand.hbm [shape: f32[4,256], index: 4, kind: output, shape index: {2}]  }
   0x1   :  { %12 = vsyncpa [#allocation3 + $0x1], 0 }
   0x2   :  { %13 = vsyncpa [#allocation5], 0 }
   0x3   :  { %15 = vsyncpa [#allocation5 + $0x1], 0  ;;  %s2070_s15 = smov 0   ;;  %s2072_s16 = smov 0  }
   0x4   :  { %s2074_s17 = smov 0   ;;  %s2076_s18 = smov 0  }
   0x5 LB: > { %s2091_s19 = sadd.s32 4294967295, %s2028_s18   ;;  %s1460_s20 = sadd.s32 4294967294, %s2028_s18   ;;  %s2028_s18 = sphi %s2076_s18, %s2491_s18   ;;  %s2024_s17 = sphi %s2074_s17, %s2490_s17   ;;  %s2020_s16 = sphi %s2072_s16, %s2489_s16   ;;  %s2016_s15 = sphi %s2070_s15, %s2488_s15  }
   0x6   : > { %s2095_s21 = sadd.s32 1, %s2028_s18   ;;  %s75_s22 = sadd.s32 1, %s2024_s17 }
   0x7   : > { %s72_s23 = ssub.s32 %s2028_s18, %s2095_s21  ;;  %p85_p0 = scmp.ne.s32.totalorder %s2024_s17, %s2020_s16 }
   0x8   : > { %p73_p1 = scmp.eq.s32.totalorder %s72_s23, 0  ;;  %p86_p2 = scmp.eq.s32.totalorder %s2091_s19, 1 }
   0x9   : > { %p91_p3 = scmp.ne.s32.totalorder %s2020_s16, %s2016_s15  ;;  %p92_p4 = scmp.eq.s32.totalorder %s1460_s20, 1 }
   0xa   : > { %s2108_s24 = scalar_select %p73_p1, %s2024_s17, %s75_s22  }
   0xb   : > { %p2110_p5 = por %p86_p2, %p85_p0  ;;  %p2114_p6 = por %p92_p4, %p91_p3 }
   0xc   : > { %p1463_p7 = scmp.ge.s32.totalorder %s2028_s18, 1  ;;  %p174_p8 = scmp.lt.s32.totalorder %s2028_s18, 3 }
   0xe   : > { %p175_p9 = pnand %p1463_p7, %p174_p8 }
   0xf   : > { %s1467_s27 = sshll.u32 (!%p175_p9), %s2091_s19, 4  ;;  %vm244_vm0 = vcmask (!%p175_p9), 261120   ;;  %v232_v0 = vld [vmem:[%s2480_s1] sm:$0xff] (!%p175_p9)  ;;  %v2030_v1 = vmov (!%p175_p9), 32   ;;  %v233_v2 = vld [vmem:[%s2480_s1 + $0x8] sm:$0xff] (!%p175_p9)  ;;  %v2031_v28 = vmov (!%p175_p9), 0.0|0.0  }
  0x10   : > { %178 = sbr.rel (%p175_p9) target bundleno = 1849 (0x739), region = 28  ;;  %p211_p10 = scmp.lt.s32.totalorder (!%p175_p9), %s1467_s27, 31  ;;  %1622 = vmatprep.mubr.msk.f32.mxu0 (!%p175_p9), %vm244_vm0, %v232_v0  ;;  %1869 = vset.pattern.permute.xlu0 (!%p175_p9), %v2030_v1  ;;  %vm2135_vm1 = vmpackc.low (!%p175_p9), %vm244_vm0, %vm244_vm0  ;;  %vm2032_vm2 = vmmov (!%p175_p9), 0   ;;  %v2033_v29 = vmov (!%p175_p9), 0.0   ;;  %v374_v30 = vld [vmem:[%s2480_s1 + $0x10] sm:$0xff] (!%p175_p9)  ;;  %v2034_v31 = vmov (!%p175_p9), 16  }
  0x11   : > { %236 = vperm.xlu0 (!%p175_p9), %1869, %v232_v0   ;;  %1637 = vmatprep.subr.mxu1 (!%p175_p9), %v2033_v29  ;;  %vm380_vm3 = vcmask (!%p175_p9), 130048   ;;  %v454_v41 = vld [vmem:[%s2480_s1 + $0x18] sm:$0x3] (!%p175_p9)  ;;  %v2035_v42 = vmov (!%p175_p9), 8   ;;  %v616_v43 = vld [vmem:[%s2480_s1 + $0x28] sm:$0xff] (!%p175_p9)  ;;  %v617_v44 = vld [vmem:[%s2480_s1 + $0x30] sm:$0xff] (!%p175_p9)  ;;  %v830_v0 = vlaneseq (!%p175_p9) }
  0x12   : > { %1639 = vmatprep.mubr.msk.f32.mxu1 (!%p175_p9), %vm2032_vm2, %v2033_v29  ;;  %1870 = vset.pattern.permute.xlu1 (!%p175_p9), %v2034_v31  ;;  %vm460_vm4 = vcmask (!%p175_p9), 64512   ;;  %v533_v50 = vld [vmem:[%s2480_s1 + $0x20] sm:$0xff] (!%p175_p9)  ;;  %v2036_v51 = vmov (!%p175_p9), 2   ;;  %vm542_vm5 = vcmask (!%p175_p9), 1041408   ;;  %vm539_vm6 = vcmask (!%p175_p9), 15360   ;;  %v709_v60 = vld [vmem:[%s2480_s1 + $0x38] sm:$0xff] (!%p175_p9) }
  0x13   : > { %377 = vperm.xlu1 (!%p175_p9), %1870, %v374_v30   ;;  %v710_v61 = vld [vmem:[%s2480_s1 + $0x40] sm:$0xff] (!%p175_p9)  ;;  %v711_v62 = vld [vmem:[%s2480_s1 + $0x48] sm:$0xff] (!%p175_p9)  ;;  %v712_v63 = vld [vmem:[%s2480_s1 + $0x50] sm:$0xff] (!%p175_p9)  ;;  %v831_v1 = vshrl.u32 (!%p175_p9), %v830_v0, 7  ;;  %s1528_s10 = sshll.u32 (!%p175_p9), %s2091_s19, 6  ;;  %s1527_s22 = sshll.u32 (!%p175_p9), %s2091_s19, 7 }
  0x14   : > { %s2374_s13 = scalar_lea.hbm (!%p175_p9), %s2482_s3, %s1528_s10  ;;  %s2039_s11 = smov (!%p175_p9), [#allocation4]  }
  0x15   : > { %241 = vperm.xlu0 (!%p175_p9), %1869, %v233_v2  }
  0x17   : > { %s2493_s27 = smov (!%p211_p10, %s1467_s27), 31  ;;  %1871 = vset.pattern.permute.xlu1 %v2035_v42 }
  0x18   : > { %s1468_s30 = sshll.u32 %s2493_s27, 3  ;;  %457 = vperm.xlu1 %1871, %v454_v41  }
  0x19   : > { %s2131_s9 = scalar_lea.vmem %s2479_s0, %s1468_s30  ;;  %1872 = vset.pattern.permute.xlu0 %v2036_v51  ;;  %s2250_s30 = sand.u32 1, %s2020_s16  }
  0x1a   : > { %v216_v4 = vld [vmem:[%s2131_s9] sm:$0xff]  ;;  %v217_v5 = vld [vmem:[%s2131_s9 + $0x8] sm:$0xff]  ;;  %v218_v6 = vld [vmem:[%s2131_s9 + $0x10] sm:$0xff]  ;;  %536 = vperm.xlu0 %1872, %v533_v50   ;;  %s1465_s5 = sshll.u32 %s2250_s30, 2  ;;  %s1464_s27 = sshll.u32 %s2250_s30, 5 }
  0x1b   : > { %v2142_v7 = vpack.c.bf16 %v217_v5, %v216_v4  ;;  %v219_v8 = vld [vmem:[%s2131_s9 + $0x18] sm:$0xff]  ;;  %v220_v10 = vld [vmem:[%s2131_s9 + $0x20] sm:$0xff]  ;;  %v221_v11 = vld [vmem:[%s2131_s9 + $0x28] sm:$0xff]  ;;  %s2255_s6 = scalar_lea.vmem [#allocation4], %s1465_s5  ;;  %v833_v4 = vadd.s32 16, %v831_v1  ;;  %v834_v5 = vadd.s32 24, %v831_v1 }
  0x1c   : > { %v2145_v9 = vpack.c.bf16 %v219_v8, %v218_v6  ;;  %v2158_v12 = vpack.c.bf16 %v221_v11, %v220_v10  ;;  %v222_v13 = vld [vmem:[%s2131_s9 + $0x30] sm:$0xff]  ;;  %v223_v14 = vld [vmem:[%s2131_s9 + $0x38] sm:$0xff]  ;;  %v224_v16 = vld [vmem:[%s2131_s9 + $0x40] sm:$0xff]  ;;  %620 = vperm.xlu1 %1871, %v616_v43   ;;  %v2037_v8 = vmov 3   ;;  %v2038_v10 = vmov 4   ;;  %s2347_s28 = scalar_lea.vmem [#allocation2], %s1464_s27 }
  0x1d   : > { %1707 = vmatprep.subr.msk.bf16.mxu0 %vm2135_vm1, %v2142_v7  ;;  %v2168_v15 = vpack.c.bf16 %v223_v14, %v222_v13  ;;  %v225_v17 = vld [vmem:[%s2131_s9 + $0x48] sm:$0xff]  ;;  %v226_v19 = vld [vmem:[%s2131_s9 + $0x50] sm:$0xff]  ;;  %v227_v20 = vld [vmem:[%s2131_s9 + $0x58] sm:$0xff]  ;;  %s1311_s8 = sshll.u32 %s2347_s28, 4  ;;  %s1327_s14 = sshll.u32 %s2255_s6, 4  ;;  %s2365_s8 = int_to_ptr.vmem [resolvable:$true] %s1311_s8  ;;  %s2378_s14 = int_to_ptr.vmem [resolvable:$true] %s1327_s14 }
  0x1e   : > { %1710 = vmatpush3.bf16.xpose.msk.msra.mxu0 %vm2135_vm1, %v2142_v7  ;;  %v2178_v18 = vpack.c.bf16 %v225_v17, %v224_v16  ;;  %v2188_v21 = vpack.c.bf16 %v227_v20, %v226_v19  ;;  %v228_v22 = vld [vmem:[%s2131_s9 + $0x60] sm:$0xff]  ;;  %v229_v23 = vld [vmem:[%s2131_s9 + $0x68] sm:$0xff]  ;;  %v230_v25 = vld [vmem:[%s2131_s9 + $0x70] sm:$0xff]  ;;  %1873 = vset.pattern.permute.xlu0 %v2034_v31  ;;  %s1906_s7 = scalar_lea.vmem %s2378_s14, 64 }
  0x1f   : > { %1713 = vmatprep.subr.msk.bf16.mxu0 %vm2135_vm1, %v2145_v9  ;;  %v2198_v24 = vpack.c.bf16 %v229_v23, %v228_v22  ;;  %v231_v26 = vld [vmem:[%s2131_s9 + $0x78] sm:$0xff]  ;;  %715 = vperm.xlu0 %1873, %v709_v60   ;;  %s1293_s9 = sand.u32 1, %s2091_s19   ;;  %p1907_p11 = scmp.ne.s32.totalorder %s2378_s14, %s1906_s7 }
  0x20   : > { %v2208_v27 = vpack.c.bf16 %v231_v26, %v230_v25  ;;  %625 = vperm.xlu1 %1871, %v617_v44   ;;  %v1098_v6 = vld [vmem:[%s2480_s1 + $0x58] sm:$0xff]  ;;  %s2385_s29 = scalar_lea.sflag [#allocation5], %s1293_s9 }
  0x21   : > { %p1908_p12 = pnand %p1907_p11, %p2110_p5 }
  0x23   : > { %730 = vperm.xlu0 %1873, %v712_v63   ;;  %p1909_p13 = pneg %p1908_p12 }
  0x24   : > { %1874 = vset.pattern.permute.xlu1 %v2034_v31 }
  0x25   : > { %720 = vperm.xlu1 %1874, %v710_v61  }
  0x26   : > { %1716 = vmatpush3.bf16.xpose.msk.msra.mxu0 %vm2135_vm1, %v2145_v9 }
  0x27   : > { %1719 = vmatprep.subr.msk.bf16.mxu0 %vm2135_vm1, %v2158_v12  ;;  %1876 = vset.pattern.permute.xlu0 %v2037_v8 }
  0x28   : > { %1178 = vperm.xlu0 %1876, %v1098_v6  }
  0x29   : > { %725 = vperm.xlu1 %1874, %v711_v62  }
  0x2c   : > { %1879 = vset.pattern.permute.xlu0 %v2035_v42 }
  0x2d   : > { %1875 = vset.pattern.permute.xlu1 %v2036_v51 }
  0x2e   : > { %1722 = vmatpush3.bf16.xpose.msk.msra.mxu0 %vm2135_vm1, %v2158_v12  ;;  %1101 = vperm.xlu1 %1875, %v1098_v6  }
  0x2f   : > { %1725 = vmatprep.subr.msk.bf16.mxu0 %vm2135_vm1, %v2168_v15 }
  0x32   : > { %1877 = vset.pattern.permute.xlu1 %v2038_v10 }
  0x33   : > { %1184 = vperm.xlu1 %1877, %v1098_v6  }
  0x36   : > { %1728 = vmatpush3.bf16.xpose.msk.msra.mxu0 %vm2135_vm1, %v2168_v15 }
  0x37   : > { %1731 = vmatprep.subr.msk.bf16.mxu0 %vm2135_vm1, %v2178_v18  ;;  %1878 = vset.pattern.permute.xlu1 %v2035_v42 }
  0x3e   : > { %1734 = vmatpush3.bf16.xpose.msk.msra.mxu0 %vm2135_vm1, %v2178_v18 }
  0x3f   : > { %1737 = vmatprep.subr.msk.bf16.mxu0 %vm2135_vm1, %v2188_v21 }
  0x46   : > { %1740 = vmatpush3.bf16.xpose.msk.msra.mxu0 %vm2135_vm1, %v2188_v21 }
  0x47   : > { %1743 = vmatprep.subr.msk.bf16.mxu0 %vm2135_vm1, %v2198_v24 }
  0x4e   : > { %1746 = vmatpush3.bf16.xpose.msk.msra.mxu0 %vm2135_vm1, %v2198_v24 }
  0x4f   : > { %1749 = vmatprep.subr.msk.bf16.mxu0 %vm2135_vm1, %v2208_v27 }
  0x56   : > { %1752 = vmatpush3.bf16.xpose.msk.msra.mxu0 %vm2135_vm1, %v2208_v27 }
  0x57   : > { %1753 = vmatprep.subr.bf16.mxu0 %v2031_v28 }
  0x5d   : > { %1623 = vmatmul.mubr.msk.f32.vlgmr.msra.gmra.mrb[0].mxu0 %vm244_vm0, %v233_v2  ;;  %v836_v2 = vand.u32 127, %v830_v0 }
  0x5e   : > { %1629 = vmatprep.mubr.msk.f32.mxu0 %vm2032_vm2, %v2033_v29 }
  0x5f   : > { %vm839_vm7 = vcmp.eq.s32.totalorder %v833_v4, %v836_v2  ;;  %vm840_vm8 = vcmp.eq.s32.totalorder %v834_v5, %v836_v2  ;;  %vm837_vm9 = vcmp.eq.s32.totalorder %v831_v1, %v836_v2 }
  0x60   : > { %v1497_v25 = vsel %vm837_vm9, 1.0, %v2033_v29 }
  0x90   : > { %v237_v32 = vpop.permute.xlu0 %236 }
  0x92   : > { %v378_v45 = vpop.permute.xlu1 %377 }
  0x94   : > { %v242_v33 = vpop.permute.xlu0 %241 }
  0x97   : > { %v458_v52 = vpop.permute.xlu1 %457 }
  0x99   : > { %v537_v56 = vpop.permute.xlu0 %536 }
  0x9b   : > { %v621_v11 = vpop.permute.xlu1 %620 }
  0x9f   : > { %v626_v13 = vpop.permute.xlu1 %625 }
 0x130   : > { %v1624_v34 = vpop.f32.mrb[0].mxu0 }
 0x131   : > { %v369_v35 = vadd.f32 %v1624_v34, %v242_v33  ;;  %v363_v36 = vpop.f32.mrb[1].mxu0 }
 0x132   : > { %v364_v37 = vadd.f32 %v363_v36, %v237_v32  ;;  %v2356_v36 = vld [vmem:[%s2480_s1 + $0x60] sm:$0xf] }
 0x133   : > { %1880 = vtanh.f32 %v369_v35  ;;  %1192 = vperm.xlu1 %1878, %v2356_v36  }
 0x134   : > { %1882 = vtanh.f32 %v364_v37 }
 0x13d   : > { %v1881_v38 = vpop.eup %1880 }
 0x13e   : > { %v1883_v39 = vpop.eup %1882 }
 0x13f   : > { %v1754_v40 = vpack.c.bf16 %v1881_v38, %v1883_v39 }
 0x141   : > { %1755 = vmatpush3.bf16.msra.mxu0 %v1754_v40 }
 0x142   : > { %1632 = vmatprep.subr.mxu0 %v2033_v29 }
 0x144   : > { %1630 = vmatmul.mubr.msk.f32.vlgmr.msra.gmra.mrb[2].mxu0 %vm380_vm3, %v374_v30 }
 0x145   : > { %1634 = vmatprep.mubr.msk.f32.mxu0 %vm2032_vm2, %v2033_v29 }
 0x217   : > { %v449_v46 = vpop.f32.mrb[2].mxu0 }
 0x218   : > { %v450_v47 = vadd.f32 %v449_v46, %v378_v45  ;;  %v1631_v48 = vpop.f32.mrb[3].mxu0 }
 0x21a   : > { %1884 = vtanh.f32 %v450_v47 }
 0x224   : > { %v1885_v49 = vpop.eup %1884 }
 0x225   : > { %1633 = vmatpush3.msra.mxu0 %v1885_v49 }
 0x226   : > { %1635 = vmatmul.mubr.msk.f32.vlgmr.msra.gmra.mrb[4].mxu0 %vm460_vm4, %v454_v41  ;;  %1695 = vmatprep.subr.mxu0 %v2033_v29 }
 0x227   : > { %1697 = vmatprep.mubr.msk.f32.mxu0 %vm2032_vm2, %v2033_v29 }
 0x2f9   : > { %v529_v53 = vpop.f32.mrb[4].mxu0 }
 0x2fa   : > { %v530_v54 = vadd.f32 %v529_v53, %v458_v52  ;;  %v1636_v55 = vpop.f32.mrb[5].mxu0 }
 0x2fc   : > { %1095 = vst [vmem:[%s2255_s6] sm:$0x3] %v530_v54  ;;  %1638 = vmatpush3.msk.msra.mxu1 %vm542_vm5, %v530_v54  ;;  %1696 = vmatpush3.msk.msra.mxu0 %vm542_vm5, %v530_v54 }
 0x2fd   : > { %1640 = vmatmul.mubr.msk.f32.vlgmr.msra.gmra.mrb[0].mxu1 %vm539_vm6, %v533_v50  ;;  %1700 = vmatprep.subr.mxu0 %v2033_v29 }
 0x2fe   : > { %1644 = vmatprep.mubr.msk.f32.mxu1 %vm460_vm4, %v616_v43  ;;  %1698 = vmatmul.mubr.msk.f32.vlgmr.msra.gmra.mrb[6].mxu0 %vm539_vm6, %v1098_v6 }
 0x2ff   : > { %1702 = vmatprep.mubr.msk.f32.mxu0 %vm2032_vm2, %v2033_v29 }
 0x3d0   : > { %v612_v57 = vpop.f32.mrb[0].mxu1 }
 0x3d1   : > { %v613_v58 = vadd.f32 %v612_v57, %v537_v56  ;;  %v1641_v59 = vpop.f32.mrb[1].mxu1 }
 0x3d3   : > { %1642 = vmatprep.subr.mxu1 %v613_v58 }
 0x3d4   : > { %1643 = vmatpush3.msra.mxu1 %v613_v58 }
 0x3d5   : > { %1645 = vmatmul.mubr.msk.f32.vlgmr.msra.gmra.mrb[2].mxu1 %vm460_vm4, %v617_v44 }
 0x3d6   : > { %1651 = vmatprep.mubr.msk.f32.mxu1 %vm380_vm3, %v709_v60 }
 0x4a8   : > { %v1646_v14 = vpop.f32.mrb[2].mxu1 }
 0x4a9   : > { %v704_v16 = vadd.f32 %v1646_v14, %v626_v13  ;;  %v698_v17 = vpop.f32.mrb[3].mxu1 }
 0x4aa   : > { %v699_v19 = vadd.f32 %v698_v17, %v621_v11 }
 0x4ab   : > { %1886 = vtanh.f32 %v704_v16 }
 0x4ac   : > { %1888 = vtanh.f32 %v699_v19 }
 0x4b5   : > { %v1887_v20 = vpop.eup %1886 }
 0x4b6   : > { %v1889_v22 = vpop.eup %1888 }
 0x4b7   : > { %v1756_v23 = vpack.c.bf16 %v1887_v20, %v1889_v22 }
 0x4b9   : > { %1757 = vmatprep.subr.bf16.mxu1 %v1756_v23 }
 0x4ba   : > { %1759 = vmatpush3.bf16.msra.mxu1 %v1756_v23 }
 0x4bb   : > { %1762 = vmatprep.subr.msk.bf16.mxu1 %vm2135_vm1, %v2142_v7 }
 0x4bd   : > { %1652 = vmatmul.mubr.msk.f32.vlgmr.msra.gmra.mrb[4].mxu1 %vm380_vm3, %v710_v61 }
 0x4be   : > { %1654 = vmatprep.mubr.msk.f32.mxu1 %vm380_vm3, %v711_v62 }
 0x4c1   : > { %1655 = vmatmul.mubr.msk.f32.gmra.mrb[6].mxu1 %vm380_vm3, %v712_v63 }
 0x4c2   : > { %1689 = vmatprep.mubr.msk.f32.mxu1 %vm244_vm0, %v1497_v25 }
 0x4c3   : > { %1765 = vmatpush3.bf16.xpose.msk.msra.mxu1 %vm2135_vm1, %v2142_v7  ;;  %v832_v7 = vadd.s32 8, %v831_v1 }
 0x4c4   : > { %1768 = vmatprep.subr.msk.bf16.mxu1 %vm2135_vm1, %v2145_v9 }
 0x4c5   : > { %vm838_vm10 = vcmp.eq.s32.totalorder %v832_v7, %v836_v2 }
 0x4cb   : > { %1771 = vmatpush3.bf16.xpose.msk.msra.mxu1 %vm2135_vm1, %v2145_v9  ;;  %v1498_v9 = vsel %vm838_vm10, 1.0, %v2033_v29 }
 0x4cc   : > { %1774 = vmatprep.subr.msk.bf16.mxu1 %vm2135_vm1, %v2158_v12 }
 0x4d3   : > { %1777 = vmatpush3.bf16.xpose.msk.msra.mxu1 %vm2135_vm1, %v2158_v12  ;;  %v1499_v12 = vsel %vm839_vm7, 1.0, %v2033_v29 }
 0x4d4   : > { %1780 = vmatprep.subr.msk.bf16.mxu1 %vm2135_vm1, %v2168_v15 }
 0x4db   : > { %1783 = vmatpush3.bf16.xpose.msk.msra.mxu1 %vm2135_vm1, %v2168_v15  ;;  %v1500_v15 = vsel %vm840_vm8, 1.0, %v2033_v29 }
 0x4dc   : > { %1786 = vmatprep.subr.msk.bf16.mxu1 %vm2135_vm1, %v2178_v18 }
 0x4e3   : > { %1789 = vmatpush3.bf16.xpose.msk.msra.mxu1 %vm2135_vm1, %v2178_v18  ;;  %v2344_v18 = vpop.f32.mrb[6].mxu0 }
 0x4e4   : > { %1792 = vmatprep.subr.msk.bf16.mxu1 %vm2135_vm1, %v2188_v21  ;;  %v1699_v3 = vpop.f32.mrb[7].mxu0 }
 0x4eb   : > { %1795 = vmatpush3.bf16.xpose.msk.msra.mxu1 %vm2135_vm1, %v2188_v21  ;;  %v716_v21 = vpop.permute.xlu0 %715 }
 0x4ec   : > { %1798 = vmatprep.subr.msk.bf16.mxu1 %vm2135_vm1, %v2198_v24 }
 0x4ef   : > { %v731_v31 = vpop.permute.xlu0 %730 }
 0x4f3   : > { %1801 = vmatpush3.bf16.xpose.msk.msra.mxu1 %vm2135_vm1, %v2198_v24  ;;  %v721_v24 = vpop.permute.xlu1 %720 }
 0x4f4   : > { %1804 = vmatprep.subr.msk.bf16.mxu1 %vm2135_vm1, %v2208_v27 }
 0x4f7   : > { %v726_v29 = vpop.permute.xlu1 %725 }
 0x4fb   : > { %1807 = vmatpush3.bf16.xpose.msk.msra.mxu1 %vm2135_vm1, %v2208_v27 }
 0x502   : > { %1690 = vmatmul.mubr.msk.f32.vlgmr.msra.gmra.mrb[8].mxu1 %vm244_vm0, %v1498_v9 }
 0x503   : > { %1692 = vmatprep.mubr.msk.f32.mxu1 %vm244_vm0, %v1499_v12 }
 0x506   : > { %1693 = vmatmul.mubr.msk.f32.gmra.mrb[10].mxu1 %vm244_vm0, %v1500_v15 }
 0x590   : > { %v1653_v26 = vpop.f32.mrb[4].mxu1 }
 0x591   : > { %v813_v27 = vadd.f32 %v1653_v26, %v721_v24  ;;  %v807_v28 = vpop.f32.mrb[5].mxu1 }
 0x592   : > { %v808_v30 = vadd.f32 %v807_v28, %v716_v21 }
 0x593   : > { %827 = vst [vmem:[%s2347_s28 + $0x8] sm:$0xff] %v813_v27  ;;  %v1055_v37 = vmul.f32 %v813_v27, %v813_v27 }
 0x594   : > { %826 = vst [vmem:[%s2347_s28] sm:$0xff] %v808_v30  ;;  %v1656_v32 = vpop.f32.mrb[6].mxu1  ;;  %v1054_v38 = vmul.f32 %v808_v30, %v808_v30 }
 0x595   : > { %v817_v33 = vpop.f32.mrb[7].mxu1  ;;  %v823_v34 = vadd.f32 %v1656_v32, %v731_v31 }
 0x596   : > { %v818_v35 = vadd.f32 %v817_v33, %v726_v29  ;;  %v1058_v39 = vadd.f32 %v1055_v37, %v1054_v38 }
 0x597   : > { %829 = vst [vmem:[%s2347_s28 + $0x18] sm:$0xff] %v823_v34  ;;  %v1057_v42 = vmul.f32 %v823_v34, %v823_v34 }
 0x598   : > { %828 = vst [vmem:[%s2347_s28 + $0x10] sm:$0xff] %v818_v35  ;;  %v1056_v40 = vmul.f32 %v818_v35, %v818_v35  ;;  %s2383_s28 = scalar_lea.hbm %s2481_s2, %s1527_s22 }
 0x59a   : > { %v1059_v41 = vadd.f32 %v1058_v39, %v1056_v40 }
 0x59c   : > { %v1060_v43 = vadd.f32 %v1059_v41, %v1057_v42 }
 0x59e   : > { %v1061_v44 = vrot.slane %v1060_v43, 4 }
 0x5a0   : > { %v1062_v45 = vadd.f32 %v1061_v44, %v1060_v43 }
 0x5a2   : > { %v1063_v46 = vrot.slane %v1062_v45, 2 }
 0x5a4   : > { %v1064_v55 = vadd.f32 %v1063_v46, %v1062_v45 }
 0x5a6   : > { %v1065_v4 = vrot.slane %v1064_v55, 1 }
 0x5a8   : > { %v1066_v19 = vadd.f32 %v1065_v4, %v1064_v55 }
 0x5aa   : > { %1890 = vrsqrt.f32 %v1066_v19  ;;  %vm1069_vm11 = vcmp.eq.f32.partialorder %v1066_v19, inf  ;;  %v1072_v33 = vand.u32 2147483648, %v1066_v19  ;;  %vm1071_vm12 = vcmp.eq.f32.partialorder %v1066_v19, 0.0 }
 0x5d5   : > { %v1691_v47 = vpop.f32.mrb[8].mxu1 }
 0x5d6   : > { %v1011_v48 = vsub.f32 %v1691_v47, %v813_v27  ;;  %v1035_v49 = vmul.f32 %v1691_v47, %v1691_v47  ;;  %v1075_v50 = vmul.f32 %v1691_v47, %v813_v27  ;;  %v991_v51 = vpop.f32.mrb[9].mxu1  ;;  %v1891_v27 = vpop.eup %1890 }
 0x5d7   : > { %v1010_v52 = vsub.f32 %v991_v51, %v808_v30  ;;  %v1034_v53 = vmul.f32 %v991_v51, %v991_v51  ;;  %v1074_v54 = vmul.f32 %v991_v51, %v808_v30  ;;  %v1068_v30 = vmul.f32 %v1891_v27, %v1066_v19 }
 0x5d8   : > { %v1015_v56 = vmul.f32 %v1011_v48, %v1011_v48 }
 0x5d9   : > { %v1014_v57 = vmul.f32 %v1010_v52, %v1010_v52  ;;  %v1038_v58 = vadd.f32 %v1035_v49, %v1034_v53  ;;  %v1078_v59 = vadd.f32 %v1075_v50, %v1074_v54  ;;  %v1694_v60 = vpop.f32.mrb[10].mxu1  ;;  %v1070_v29 = vsel %vm1069_vm11, %v1066_v19, %v1068_v30  ;;  %v1102_v53 = vpop.permute.xlu1 %1101 }
 0x5da   : > { %v1013_v61 = vsub.f32 %v1694_v60, %v823_v34  ;;  %v1001_v62 = vpop.f32.mrb[11].mxu1  ;;  %v1037_v5 = vmul.f32 %v1694_v60, %v1694_v60  ;;  %v1077_v6 = vmul.f32 %v1694_v60, %v823_v34  ;;  %v1073_v38 = vsel %vm1071_vm12, %v1072_v33, %v1070_v29 }
 0x5db   : > { %v1018_v63 = vadd.f32 %v1015_v56, %v1014_v57  ;;  %v1012_v0 = vsub.f32 %v1001_v62, %v818_v35  ;;  %v1036_v1 = vmul.f32 %v1001_v62, %v1001_v62  ;;  %v1076_v2 = vmul.f32 %v1001_v62, %v818_v35 }
 0x5dc   : > { %v1017_v13 = vmul.f32 %v1013_v61, %v1013_v61  ;;  %v1091_v43 = vmax.f32 %v1073_v38, 1e-08 }
 0x5dd   : > { %v1016_v8 = vmul.f32 %v1012_v0, %v1012_v0  ;;  %v1039_v10 = vadd.f32 %v1038_v58, %v1036_v1  ;;  %v1079_v11 = vadd.f32 %v1078_v59, %v1076_v2  ;;  %v1179_v58 = vpop.permute.xlu0 %1178 }
 0x5df   : > { %v1019_v14 = vadd.f32 %v1018_v63, %v1016_v8  ;;  %v1040_v16 = vadd.f32 %v1039_v10, %v1037_v5  ;;  %v1080_v17 = vadd.f32 %v1079_v11, %v1077_v6  ;;  %v1185_v63 = vpop.permute.xlu1 %1184 }
 0x5e1   : > { %v1020_v20 = vadd.f32 %v1019_v14, %v1017_v13  ;;  %v1041_v22 = vrot.slane %v1040_v16, 4  ;;  %v1081_v31 = vrot.slane %v1080_v17, 4 }
 0x5e3   : > { %v1021_v23 = vrot.slane %v1020_v20, 4  ;;  %v1042_v25 = vadd.f32 %v1041_v22, %v1040_v16  ;;  %v1082_v35 = vadd.f32 %v1081_v31, %v1080_v17 }
 0x5e5   : > { %v1022_v7 = vadd.f32 %v1021_v23, %v1020_v20  ;;  %v1043_v9 = vrot.slane %v1042_v25, 2  ;;  %v1083_v44 = vrot.slane %v1082_v35, 2 }
 0x5e7   : > { %v1023_v12 = vrot.slane %v1022_v7, 2  ;;  %v1044_v15 = vadd.f32 %v1043_v9, %v1042_v25  ;;  %v1084_v48 = vadd.f32 %v1083_v44, %v1082_v35 }
 0x5e9   : > { %v1024_v21 = vadd.f32 %v1023_v12, %v1022_v7  ;;  %v1045_v3 = vrot.slane %v1044_v15, 1  ;;  %v1085_v50 = vrot.slane %v1084_v48, 1 }
 0x5eb   : > { %v1046_v24 = vadd.f32 %v1045_v3, %v1044_v15  ;;  %v1025_v26 = vrot.slane %v1024_v21, 1  ;;  %v1086_v56 = vadd.f32 %v1085_v50, %v1084_v48 }
 0x5ed   : > { %1892 = vrsqrt.f32 %v1046_v24  ;;  %v1026_v28 = vadd.f32 %v1025_v26, %v1024_v21  ;;  %vm1049_vm13 = vcmp.eq.f32.partialorder %v1046_v24, inf  ;;  %v1052_v37 = vand.u32 2147483648, %v1046_v24 }
 0x5ee   : > { %vm1051_vm14 = vcmp.eq.f32.partialorder %v1046_v24, 0.0 }
 0x5ef   : > { %1894 = vrsqrt.f32 %v1026_v28  ;;  %vm1029_vm15 = vcmp.eq.f32.partialorder %v1026_v28, inf  ;;  %v1032_v51 = vand.u32 2147483648, %v1026_v28  ;;  %vm1031_vm0 = vcmp.eq.f32.partialorder %v1026_v28, 0.0 }
 0x5f7   : > { %v1893_v32 = vpop.eup %1892 }
 0x5f8   : > { %v1048_v34 = vmul.f32 %v1893_v32, %v1046_v24 }
 0x5f9   : > { %v1895_v45 = vpop.eup %1894 }
 0x5fa   : > { %v1050_v39 = vsel %vm1049_vm13, %v1046_v24, %v1048_v34  ;;  %v1028_v47 = vmul.f32 %v1895_v45, %v1026_v28 }
 0x5fb   : > { %v1053_v40 = vsel %vm1051_vm14, %v1052_v37, %v1050_v39 }
 0x5fc   : > { %v1087_v41 = vmax.f32 %v1053_v40, 1.1920929e-07  ;;  %v1090_v42 = vmax.f32 %v1053_v40, 1e-08  ;;  %v1030_v49 = vsel %vm1029_vm15, %v1026_v28, %v1028_v47 }
 0x5fd   : > { %v1033_v54 = vsel %vm1031_vm0, %v1032_v51, %v1030_v49 }
 0x5fe   : > { %1896 = vrcp.f32 %v1087_v41  ;;  %v1092_v46 = vmul.f32 %v1091_v43, %v1090_v42 }
 0x600   : > { %1898 = vrcp.f32 %v1092_v46 }
 0x608   : > { %v1897_v52 = vpop.eup %1896 }
 0x609   : > { %v1089_v55 = vmul.f32 %v1897_v52, %v1033_v54 }
 0x60a   : > { %v1899_v57 = vpop.eup %1898 }
 0x60b   : > { %1096 = vst [vmem:[%s2255_s6 + $0x2] sm:$0x1] %v1089_v55  ;;  %v1104_v59 = vmul.f32 %v1102_v53, %v1089_v55  ;;  %v1094_v60 = vmul.f32 %v1899_v57, %v1086_v56 }
 0x60d   : > { %v1174_v61 = vadd.f32 %v2344_v18, %v1104_v59  ;;  %1097 = vst [vmem:[%s2255_s6 + $0x3] sm:$0x1] %v1094_v60  ;;  %v1181_v62 = vmul.f32 %v1179_v58, %v1094_v60  ;;  %s1910_s6 = sshll.u32 %s2039_s11, 4  ;;  %s1911_s6 = int_to_ptr.vmem [resolvable:$false] %s1910_s6 }
 0x60e   : > { %s1912_s12 = scalar_lea.vmem %s1911_s6, 128  ;;  %p1913_p0 = scmp.lt.s32.totalorder %s2378_s14, %s1911_s6 }
 0x60f   : > { %v1182_v0 = vadd.f32 %v1181_v62, %v1174_v61  ;;  %p1914_p1 = scmp.lt.s32.totalorder %s1912_s12, %s1906_s7 }
 0x611   : > { %v1187_v1 = vadd.f32 %v1185_v63, %v1182_v0  ;;  %p1915_p2 = por %p1914_p1, %p1913_p0 }
 0x613   : > { %1900 = vtanh.f32 %v1187_v1  ;;  %p1916_p3 = pnand %p1915_p2, %p1909_p13 }
 0x61d   : > { %v1901_v2 = vpop.eup %1900 }
 0x61e   : > { %1701 = vmatpush3.msra.mxu0 %v1901_v2 }
 0x61f   : > { %1703 = vmatmul.mubr.msk.f32.vlgmr.msra.gmra.mrb[8].mxu0 %vm460_vm4, %v2356_v36 }
 0x620   : > { %1919 = shalt.err (!%p1916_p3)
}
 0x621   : > { %s1920_s9 = scalar_lea.hbm %s2374_s13, 64  ;;  %s1924_s27 = scalar_lea.hbm %s2482_s3, 128 }
 0x622   : > { %p1921_p4 = scmp.ne.s32.totalorder %s2374_s13, %s1920_s9  ;;  %p1925_p9 = scmp.lt.u32.totalorder %s2374_s13, %s2482_s3 }
 0x623   : > { %p1926_p10 = scmp.lt.u32.totalorder %s1924_s27, %s1920_s9  ;;  %p1928_p12 = scmp.lt.u32.totalorder %s1920_s9, %s2374_s13 }
 0x624   : > { %p1922_p7 = pnand %p1921_p4, %p2110_p5 }
 0x625   : > { %p1927_p11 = por %p1926_p10, %p1925_p9 }
 0x626   : > { %p1923_p8 = pneg %p1922_p7 }
 0x627   : > { %p1929_p13 = por %p1928_p12, %p1927_p11 }
 0x629   : > { %p1930_p0 = pnand %p1929_p13, %p1923_p8 }
 0x62b   : > { %1933 = shalt.err (!%p1930_p0)
}
 0x62c   : > { %1809 = dma.vmem_to_hbm [thread:$0]  (%p2110_p5), %s2378_s14, 64, %s2374_s13, %s2385_s29  }
 0x62d   : > { %s1289_s7 = scalar_lea.sflag [#allocation3], %s2250_s30  ;;  %s1934_s12 = scalar_lea.vmem %s2365_s8, 512 }
 0x62e   : > { %p1935_p1 = scmp.ne.s32.totalorder %s2365_s8, %s1934_s12  ;;  %s2040_s9 = smov [#allocation2]  }
 0x62f   : > { %s1938_s22 = sshll.u32 %s2040_s9, 4  ;;  %s1939_s22 = int_to_ptr.vmem [resolvable:$false] %s1938_s22 }
 0x630   : > { %p1936_p2 = pnand %p1935_p1, %p2110_p5  ;;  %s1940_s23 = scalar_lea.vmem %s1939_s22, 1024 }
 0x631   : > { %p1941_p4 = scmp.lt.s32.totalorder %s2365_s8, %s1939_s22  ;;  %p1942_p7 = scmp.lt.s32.totalorder %s1940_s23, %s1934_s12 }
 0x632   : > { %p1937_p3 = pneg %p1936_p2 }
 0x633   : > { %p1943_p8 = por %p1942_p7, %p1941_p4 }
 0x635   : > { %p1944_p9 = pnand %p1943_p8, %p1937_p3 }
 0x637   : > { %1947 = shalt.err (!%p1944_p9)
}
 0x638   : > { %s1948_s13 = scalar_lea.hbm %s2383_s28, 512  ;;  %s1952_s11 = scalar_lea.hbm %s2481_s2, 1024 }
 0x639   : > { %p1949_p10 = scmp.ne.s32.totalorder %s2383_s28, %s1948_s13  ;;  %p1953_p13 = scmp.lt.u32.totalorder %s2383_s28, %s2481_s2 }
 0x63a   : > { %p1954_p0 = scmp.lt.u32.totalorder %s1952_s11, %s1948_s13  ;;  %p1956_p2 = scmp.lt.u32.totalorder %s1948_s13, %s2383_s28 }
 0x63b   : > { %p1950_p11 = pnand %p1949_p10, %p2110_p5 }
 0x63c   : > { %p1955_p1 = por %p1954_p0, %p1953_p13 }
 0x63d   : > { %p1951_p12 = pneg %p1950_p11 }
 0x63e   : > { %p1957_p3 = por %p1956_p2, %p1955_p1 }
 0x640   : > { %p1958_p4 = pnand %p1957_p3, %p1951_p12 }
 0x642   : > { %1961 = shalt.err (!%p1958_p4)
}
 0x643   : > { %s2041_s12 = smov 128   ;;  %s2042_s22 = smov 256   ;;  %v1193_v18 = vpop.permute.xlu1 %1192  ;;  %vm1267_vm1 = vcmask 1043456  }
 0x644   : > { %s2043_s23 = smov 8   ;;  %s2440_s14 = scalar_lea.hbm %s2483_s4, %s1528_s10 }
 0x645   : > { %1808 = dma.vmem_to_hbm [thread:$0]  (%p2110_p5), %s2365_s8, 512, %s2383_s28, %s1289_s7, %s2041_s12, %s2042_s22, %s2043_s23  }
 0x646   : > { %s209_s8 = scalar_lea.vmem [#allocation6], %s1465_s5  ;;  %s2044_s11 = smov [#allocation6]  }
 0x647   : > { %s1340_s28 = sshll.u32 %s209_s8, 4  ;;  %s1966_s6 = sshll.u32 %s2044_s11, 4  ;;  %s1341_s28 = int_to_ptr.vmem [resolvable:$true] %s1340_s28  ;;  %s1967_s6 = int_to_ptr.vmem [resolvable:$false] %s1966_s6 }
 0x648   : > { %s1962_s27 = scalar_lea.vmem %s1341_s28, 64  ;;  %s1968_s30 = scalar_lea.vmem %s1967_s6, 128 }
 0x649   : > { %p1963_p7 = scmp.ne.s32.totalorder %s1341_s28, %s1962_s27  ;;  %p1969_p10 = scmp.lt.s32.totalorder %s1341_s28, %s1967_s6 }
 0x64a   : > { %p1970_p11 = scmp.lt.s32.totalorder %s1968_s30, %s1962_s27 }
 0x64b   : > { %p1964_p8 = pnand %p1963_p7, %p2110_p5 }
 0x64c   : > { %p1971_p12 = por %p1970_p11, %p1969_p10 }
 0x64d   : > { %p1965_p9 = pneg %p1964_p8 }
 0x64f   : > { %p1972_p13 = pnand %p1971_p12, %p1965_p9 }
 0x6f2   : > { %v1263_v36 = vpop.f32.mrb[8].mxu0 }
 0x6f3   : > { %v1264_v4 = vadd.f32 %v1263_v36, %v1193_v18  ;;  %v1704_v5 = vpop.f32.mrb[9].mxu0 }
 0x6f5   : > { %v1268_v6 = vsel %vm1267_vm1, %v1264_v4, -inf }
 0x6f6   : > { %v1269_v8 = vrot.slane %v1268_v6, 4 }
 0x6f8   : > { %v1270_v10 = vmax.f32 %v1268_v6, %v1269_v8 }
 0x6fa   : > { %v1271_v11 = vrot.slane %v1270_v10, 2 }
 0x6fc   : > { %v1272_v13 = vmax.f32 %v1270_v10, %v1271_v11 }
 0x6fe   : > { %v1273_v14 = vrot.slane %v1272_v13, 1 }
 0x700   : > { %v1274_v16 = vmax.f32 %v1272_v13, %v1273_v14 }
 0x702   : > { %v1275_v17 = vsub.f32 %v1264_v4, %v1274_v16 }
 0x704   : > { %v1276_v19 = vmul.f32 1.442695, %v1275_v17 }
 0x706   : > { %1902 = vpow2.f32 %v1276_v19 }
 0x710   : > { %v1903_v20 = vpop.eup %1902 }
 0x711   : > { %v1278_v22 = vsel %vm1267_vm1, %v1903_v20, 0.0 }
 0x712   : > { %v1279_v23 = vrot.slane %v1278_v22, 4 }
 0x714   : > { %v1280_v25 = vadd.f32 %v1279_v23, %v1278_v22 }
 0x716   : > { %v1281_v7 = vrot.slane %v1280_v25, 2 }
 0x718   : > { %v1282_v9 = vadd.f32 %v1281_v7, %v1280_v25 }
 0x71a   : > { %v1283_v12 = vrot.slane %v1282_v9, 1 }
 0x71c   : > { %v1284_v15 = vadd.f32 %v1283_v12, %v1282_v9 }
 0x71e   : > { %1904 = vrcp.f32 %v1284_v15 }
 0x728   : > { %v1905_v21 = vpop.eup %1904 }
 0x729   : > { %v1286_v3 = vmul.f32 %v1905_v21, %v1903_v20 }
 0x72b   : > { %1287 = vst [vmem:[%s209_s8] sm:$0xf] %v1286_v3 }
 0x72c   : > { %1975 = shalt.err (!%p1972_p13)
}
 0x72d   : > { %s1976_s19 = scalar_lea.hbm %s2440_s14, 64  ;;  %s1980_s9 = scalar_lea.hbm %s2483_s4, 128 }
 0x72e   : > { %p1977_p0 = scmp.ne.s32.totalorder %s2440_s14, %s1976_s19  ;;  %p1981_p3 = scmp.lt.u32.totalorder %s2440_s14, %s2483_s4 }
 0x72f   : > { %p1982_p4 = scmp.lt.u32.totalorder %s1980_s9, %s1976_s19  ;;  %p1984_p8 = scmp.lt.u32.totalorder %s1976_s19, %s2440_s14 }
 0x730   : > { %p1978_p1 = pnand %p1977_p0, %p2110_p5 }
 0x731   : > { %p1983_p7 = por %p1982_p4, %p1981_p3 }
 0x732   : > { %p1979_p2 = pneg %p1978_p1 }
 0x733   : > { %p1985_p9 = por %p1984_p8, %p1983_p7 }
 0x735   : > { %p1986_p10 = pnand %p1985_p9, %p1979_p2 }
 0x737   : > { %1989 = shalt.err (!%p1986_p10)
}
 0x738   : > { %1810 = dma.vmem_to_hbm [thread:$0]  (%p2110_p5), %s1341_s28, 64, %s2440_s14, %s2385_s29  }
 0x739 PF: > { %p1824_p11 = scmp.ge.s32.totalorder %s2028_s18, 2  ;;  %s1352_s23 = sand.u32 1, %s2016_s15  }
 0x73a   : > { %s1353_s8 = scalar_lea.sflag [#allocation3], %s1352_s23 }
 0x73b   : > { %p1815_p12 = pnand %p1824_p11, %p2114_p6 }
 0x73d   : > { %2007 = dma.done.wait (!%p1815_p12), %s1353_s8, 512  }
 0x73e   : > { %2009 = vsyncadd (!%p1815_p12), %s1353_s8, 4294966784  ;;  %s1361_s7 = sand.u32 1, %s1460_s20  }
 0x73f   : > { %s1362_s13 = scalar_lea.sflag [#allocation5], %s1361_s7 }
 0x740   : > { %2011 = dma.done.wait (!%p1815_p12), %s1362_s13, 128  }
 0x741   : > { %2013 = vsyncadd (!%p1815_p12), %s1362_s13, 4294967168  ;;  %p18_p5 = scmp.ge.s32.totalorder %s2095_s21, 4   ;;  %s2488_s15 = smov %s2020_s16 }
 0x742   : > { %s2489_s16 = smov %s2024_s17  ;;  %s2490_s17 = smov %s2108_s24 }
 0x743   : > { %s2491_s18 = smov %s2095_s21  ;;  %20 = sbr.rel (!%p18_p5) target bundleno = 5 (0x5), region = 95 }
 0x74a   :  { %1376 = vsyncpa [#allocation3], 1 }
 0x74b   :  { %1378 = vsyncpa [#allocation3 + $0x1], 1 }
 0x74c   :  { %1379 = vsyncpa [#allocation5], 1 }
 0x74d   :  { %1381 = vsyncpa [#allocation5 + $0x1], 1 }

</bundles_post_ra>
